<compile_context>
chip_gen: v7x
topology: tpu7x:2x2x1
jax: 0.10.0
libtpu: 0.0.40
codegen_flags: <defaults>
</compile_context>

<pallas_src>
import functools
from collections import OrderedDict

import jax
import jax.numpy as jnp
from jax.experimental import pallas as pl
from jax.experimental.pallas import tpu as pltpu


# ------------------------------ Pallas kernel -------------------------------

def _fused_late_fusion_kernel(
    xr_ref, xd_ref,
    w1r_ref, b1r_ref, w1d_ref, b1d_ref,
    w2c_ref, b2c_ref,
    o1_ref, o2_ref,
    a_ref,
    *, H, W, c_rgb, c_depth, c1, c2):
  """Both backbones (2 conv+ReLU layers each) + add-fusion for one batch item.

  Layouts (per batch item):
    inputs   x*_ref : (1, Cin, L_ext)    flat zero-padded spatial, Cin on sublanes
    weights  w1*    : (C1, 9*Cin)        tap-major columns (layer1, VPU MACs)
             w2c    : (9*2*C2, 2*C1)     tap-major BLOCK-DIAGONAL row blocks
                                         (rgb top-left, depth bottom-right)
    biases   b1*    : (C1, 1), b2c : (2*C2, 1)  (rgb rows first, then depth)
    outputs  o1/o2  : (1, C, H*P)        strided-flat spatial (P = W+2) on lanes
    scratch  a_ref  : (2*C1, L_ext)      zero-padded layer1 activations
                                         (rgb rows 0..C1, depth rows C1..2*C1)
  """
  P = W + 2
  HP = H * P
  taps = [(dy, dx) for dy in range(3) for dx in range(3)]

  # Lanes whose strided-flat column index falls in the junk (wraparound) zone.
  col = jax.lax.broadcasted_iota(jnp.int32, (1, HP), 1) % P
  valid = col < W

  def conv_relu_macs(x_ref, w_ref, b_ref, cin, cout):
    # Layer 1: Cin is tiny (1 or 3) -> VPU broadcast multiply-accumulate.
    acc = jnp.zeros((cout, HP), jnp.float32)
    for t, (dy, dx) in enumerate(taps):
      off = dy * P + dx
      for c in range(cin):
        xrow = x_ref[0, c:c + 1, off:off + HP]             # (1, HP)
        wcol = w_ref[:, t * cin + c:t * cin + c + 1]       # (cout, 1)
        acc = acc + wcol * xrow
    return jnp.maximum(acc + b_ref[...], 0.0)

  # --- layer 1 of both backbones (stays in VMEM / vregs) ---
  f1_r = jnp.where(valid, conv_relu_macs(xr_ref, w1r_ref, b1r_ref, c_rgb, c1), 0.0)
  f1_d = jnp.where(valid, conv_relu_macs(xd_ref, w1d_ref, b1d_ref, c_depth, c1), 0.0)

  # Re-insert the 1-pixel zero halo so layer-2's taps see proper zero padding.
  # (Full re-zero every step: the scratch is per-core, and with the batch axis
  # sharded across TensorCores a "zero once at program_id==0" would be wrong.)
  a_ref[...] = jnp.zeros_like(a_ref)
  a_ref[0:c1, P + 1:P + 1 + HP] = f1_r
  a_ref[c1:2 * c1, P + 1:P + 1 + HP] = f1_d

  # --- layer 2 of BOTH backbones in one MXU pass per tap ---
  # (2*c2, 2*c1) block-diagonal weight @ (2*c1, HP) stacked activations.
  acc2 = jnp.zeros((2 * c2, HP), jnp.float32)
  for t, (dy, dx) in enumerate(taps):
    off = dy * P + dx
    a_tap = a_ref[:, off:off + HP]                         # (2*c1, HP)
    w_tap = w2c_ref[t * 2 * c2:(t + 1) * 2 * c2, :]        # (2*c2, 2*c1)
    acc2 = acc2 + jnp.dot(w_tap, a_tap,
                          preferred_element_type=jnp.float32)
  z2 = jnp.maximum(acc2 + b2c_ref[...], 0.0)               # (2*c2, HP)

  # --- Late fusion (elementwise add) fused into the epilogue ---
  o1_ref[0, :, :] = (f1_r + f1_d).astype(o1_ref.dtype)
  o2_ref[0, :, :] = (z2[:c2, :] + z2[c2:, :]).astype(o2_ref.dtype)


# ------------------------------ fused forward -------------------------------

@jax.jit
def _fused_forward(rgb_params, depth_params, x_rgb_nchw, x_d_nchw):
  """Whole IntermediateLayerGetterLateFusion forward in one pallas_call."""
  N, c_rgb, H, W = x_rgb_nchw.shape
  c_depth = x_d_nchw.shape[1]
  c1 = rgb_params["layer1"]["w"].shape[0]
  c2 = rgb_params["layer2"]["w"].shape[0]
  P = W + 2
  HP = H * P
  L_ext = (H + 3) * P          # padded grid + one extra zero row for tap slack

  def prep_x(x):               # NCHW -> (N, Cin, L_ext) flat zero-padded
    xp = jnp.pad(x, ((0, 0), (0, 0), (1, 1), (1, 1)))
    xf = xp.reshape(xp.shape[0], xp.shape[1], (H + 2) * P)
    return jnp.pad(xf, ((0, 0), (0, 0), (0, P)))

  def prep_w1(w):              # (Cout, Cin, 3, 3) -> (Cout, 9*Cin) tap-major
    return jnp.transpose(w, (0, 2, 3, 1)).reshape(w.shape[0], -1)

  def prep_w2_blockdiag(wr, wd):
    # (Cout, Cin, 3, 3) x2 -> (9*2*Cout, 2*Cin): tap-major block-diagonal rows.
    co, ci = wr.shape[0], wr.shape[1]
    wr_t = jnp.transpose(wr, (2, 3, 0, 1))                 # (3,3,co,ci)
    wd_t = jnp.transpose(wd, (2, 3, 0, 1))
    z = jnp.zeros((3, 3, co, ci), wr.dtype)
    top = jnp.concatenate([wr_t, z], axis=-1)              # (3,3,co,2ci)
    bot = jnp.concatenate([z, wd_t], axis=-1)              # (3,3,co,2ci)
    blk = jnp.concatenate([top, bot], axis=-2)             # (3,3,2co,2ci)
    return blk.reshape(9 * 2 * co, 2 * ci)

  def prep_b(b):
    return b.reshape(-1, 1)

  xr, xd = prep_x(x_rgb_nchw), prep_x(x_d_nchw)
  w1r, b1r = prep_w1(rgb_params["layer1"]["w"]), prep_b(rgb_params["layer1"]["b"])
  w1d, b1d = prep_w1(depth_params["layer1"]["w"]), prep_b(depth_params["layer1"]["b"])
  w2c = prep_w2_blockdiag(rgb_params["layer2"]["w"], depth_params["layer2"]["w"])
  b2c = prep_b(jnp.concatenate([rgb_params["layer2"]["b"],
                                depth_params["layer2"]["b"]]))

  kernel = functools.partial(_fused_late_fusion_kernel, H=H, W=W,
                             c_rgb=c_rgb, c_depth=c_depth, c1=c1, c2=c2)

  o1, o2 = pl.pallas_call(
      kernel,
      out_shape=(jax.ShapeDtypeStruct((N, c1, HP), jnp.float32),
                 jax.ShapeDtypeStruct((N, c2, HP), jnp.float32)),
      grid=(N,),
      in_specs=[
          pl.BlockSpec((1, c_rgb, L_ext), lambda n: (n, 0, 0)),
          pl.BlockSpec((1, c_depth, L_ext), lambda n: (n, 0, 0)),
          pl.BlockSpec((c1, 9 * c_rgb), lambda n: (0, 0)),
          pl.BlockSpec((c1, 1), lambda n: (0, 0)),
          pl.BlockSpec((c1, 9 * c_depth), lambda n: (0, 0)),
          pl.BlockSpec((c1, 1), lambda n: (0, 0)),
          pl.BlockSpec((9 * 2 * c2, 2 * c1), lambda n: (0, 0)),
          pl.BlockSpec((2 * c2, 1), lambda n: (0, 0)),
      ],
      out_specs=(pl.BlockSpec((1, c1, HP), lambda n: (n, 0, 0)),
                 pl.BlockSpec((1, c2, HP), lambda n: (n, 0, 0))),
      scratch_shapes=[pltpu.VMEM((2 * c1, L_ext), jnp.float32)],
      compiler_params=pltpu.CompilerParams(
          dimension_semantics=("parallel",)),
  )(xr, xd, w1r, b1r, w1d, b1d, w2c, b2c)

  # Drop the halo columns of the strided-flat spatial axis -> NCHW directly.
  def unstride(o, c):
    return o.reshape(N, c, H, P)[:, :, :, :W]

  return {"layer1": unstride(o1, c1), "layer2": unstride(o2, c2)}


# ------------------- IntermediateLayerGetter (late fusion) ------------------

def make_backbone_params(key, cin, c1, c2):
  """Two conv3x3+ReLU layers; deterministic init."""
  k1, k2, k3, k4 = jax.random.split(key, 4)
  return OrderedDict(
      layer1=dict(
          w=0.1 * jax.random.normal(k1, (c1, cin, 3, 3), jnp.float32),
          b=0.05 * jax.random.normal(k2, (c1,), jnp.float32),
      ),
      layer2=dict(
          w=0.1 * jax.random.normal(k3, (c2, c1, 3, 3), jnp.float32),
          b=0.05 * jax.random.normal(k4, (c2,), jnp.float32),
      ),
  )


def intermediate_layer_getter_late_fusion(rgb_params, depth_params,
                                          return_layers, x_rgb_nchw, x_d_nchw):
  """Mirror of IntermediateLayerGetterLateFusion._forward with add-fusion."""
  feats = _fused_forward(rgb_params, depth_params, x_rgb_nchw, x_d_nchw)
  out = OrderedDict()
  remaining = dict(return_layers)
  for name in rgb_params:                 # registration / execution order
    if name in remaining:
      out[remaining.pop(name)] = feats[name]
    if not remaining:
      break
  return out


# ------------------------------- pure-JAX ref --------------------------------

def _ref_conv_relu(x, w, b):
  y = jax.lax.conv_general_dilated(
      x, w, window_strides=(1, 1), padding=((1, 1), (1, 1)),
      dimension_numbers=("NCHW", "OIHW", "NCHW"),
      precision=jax.lax.Precision.HIGHEST)
  return jax.nn.relu(y + b[None, :, None, None])


def _ref_forward(rgb_params, depth_params, x_rgb, x_d):
  r1 = _ref_conv_relu(x_rgb, rgb_params["layer1"]["w"], rgb_params["layer1"]["b"])
  r2 = _ref_conv_relu(r1, rgb_params["layer2"]["w"], rgb_params["layer2"]["b"])
  d1 = _ref_conv_relu(x_d, depth_params["layer1"]["w"], depth_params["layer1"]["b"])
  d2 = _ref_conv_relu(d1, depth_params["layer2"]["w"], depth_params["layer2"]["b"])
  return OrderedDict(feat1=r1 + d1, feat2=r2 + d2)


# ----------------------------------- main ------------------------------------

if __name__ == "__main__":
  key = jax.random.PRNGKey(0)
  k_rgb_in, k_d_in, k_rgb_bb, k_d_bb = jax.random.split(key, 4)

  N, H, W = 2, 16, 16
  C_RGB, C_DEPTH = 3, 1
  C1, C2 = 8, 16

  x_rgb = jax.random.normal(k_rgb_in, (N, C_RGB, H, W), jnp.float32)   # NCHW
  x_d = jax.random.normal(k_d_in, (N, C_DEPTH, H, W), jnp.float32)     # NCHW

  rgb_params = make_backbone_params(k_rgb_bb, C_RGB, C1, C2)
  depth_params = make_backbone_params(k_d_bb, C_DEPTH, C1, C2)

  return_layers = {"layer1": "feat1", "layer2": "feat2"}

  out = intermediate_layer_getter_late_fusion(
      rgb_params, depth_params, return_layers, x_rgb, x_d)
  jax.block_until_ready(out)

  # shapes match the PyTorch NCHW convention
  assert out["feat1"].shape == (N, C1, H, W)
  assert out["feat2"].shape == (N, C2, H, W)

  # numerical check against a pure-JAX reference (loose tol covers MXU passes)
  ref = _ref_forward(rgb_params, depth_params, x_rgb, x_d)
  for name in ("feat1", "feat2"):
    assert bool(jnp.allclose(out[name], ref[name], atol=2e-2, rtol=2e-2)), name

  print("KERNEL_OK")
</pallas_src>

<mosaic_0001>
module attributes {stable_mosaic.version = 11 : i64} {
  func.func @_fused_late_fusion_kernel(%arg0: i32, %arg1: memref<1x3x342xf32, #tpu.memory_space<vmem>>, %arg2: memref<1x1x342xf32, #tpu.memory_space<vmem>>, %arg3: memref<8x27xf32, #tpu.memory_space<vmem>>, %arg4: memref<8x1xf32, #tpu.memory_space<vmem>>, %arg5: memref<8x9xf32, #tpu.memory_space<vmem>>, %arg6: memref<8x1xf32, #tpu.memory_space<vmem>>, %arg7: memref<288x16xf32, #tpu.memory_space<vmem>>, %arg8: memref<32x1xf32, #tpu.memory_space<vmem>>, %arg9: memref<1x8x288xf32, #tpu.memory_space<vmem>>, %arg10: memref<1x16x288xf32, #tpu.memory_space<vmem>>, %arg11: memref<16x342xf32, #tpu.memory_space<vmem>>) attributes {dimension_semantics = [#tpu.dimension_semantics<parallel>], iteration_bounds = array<i64: 2>, scalar_prefetch = 0 : i64, scratch_operands = 1 : i64, tpu.core_type = #tpu.core_type<tc>, window_params = [{transform_indices = @transform_0, window_bounds = array<i64: 1, 3, 342>}, {transform_indices = @transform_1, window_bounds = array<i64: 1, 1, 342>}, {pipeline_mode = #tpu.pipeline_mode<synchronous>, transform_indices = @transform_2, window_bounds = array<i64: 8, 27>}, {pipeline_mode = #tpu.pipeline_mode<synchronous>, transform_indices = @transform_3, window_bounds = array<i64: 8, 1>}, {pipeline_mode = #tpu.pipeline_mode<synchronous>, transform_indices = @transform_4, window_bounds = array<i64: 8, 9>}, {pipeline_mode = #tpu.pipeline_mode<synchronous>, transform_indices = @transform_5, window_bounds = array<i64: 8, 1>}, {pipeline_mode = #tpu.pipeline_mode<synchronous>, transform_indices = @transform_6, window_bounds = array<i64: 288, 16>}, {pipeline_mode = #tpu.pipeline_mode<synchronous>, transform_indices = @transform_7, window_bounds = array<i64: 32, 1>}, {transform_indices = @transform_8, window_bounds = array<i64: 1, 8, 288>}, {transform_indices = @transform_9, window_bounds = array<i64: 1, 16, 288>}]} {
    %0 = tpu.iota {dimensions = array<i32: 1>} : vector<1x288xi32>
    %c18_i32 = arith.constant 18 : i32
    %c0_i32 = arith.constant 0 : i32
    %1 = arith.cmpi eq, %c18_i32, %c0_i32 : i32
    %c1_i32 = arith.constant 1 : i32
    %2 = arith.select %1, %c1_i32, %c18_i32 : i32
    %3 = vector.broadcast %2 : i32 to vector<1x288xi32>
    %4 = arith.remsi %0, %3 : vector<1x288xi32>
    %c0_i32_0 = arith.constant 0 : i32
    %5 = vector.broadcast %c0_i32_0 : i32 to vector<1x288xi32>
    %6 = arith.cmpi ne, %4, %5 : vector<1x288xi32>
    %c0_i32_1 = arith.constant 0 : i32
    %7 = vector.broadcast %c0_i32_1 : i32 to vector<1x288xi32>
    %8 = arith.cmpi slt, %4, %7 : vector<1x288xi32>
    %c0_i32_2 = arith.constant 0 : i32
    %9 = arith.cmpi slt, %2, %c0_i32_2 : i32
    %10 = vector.broadcast %9 : i1 to vector<1x288xi1>
    %11 = vector.broadcast %10 : vector<1x288xi1> to vector<1x288xi1>
    %12 = arith.xori %8, %11 : vector<1x288xi1>
    %13 = arith.andi %12, %6 : vector<1x288xi1>
    %14 = vector.broadcast %2 : i32 to vector<1x288xi32>
    %15 = arith.addi %4, %14 : vector<1x288xi32>
    %16 = arith.select %13, %15, %4 : vector<1x288xi1>, vector<1x288xi32>
    %c16_i32 = arith.constant 16 : i32
    %17 = vector.broadcast %c16_i32 : i32 to vector<1x288xi32>
    %18 = arith.cmpi slt, %16, %17 : vector<1x288xi32>
    %cst = arith.constant 0.000000e+00 : f32
    %19 = vector.broadcast %cst : f32 to vector<8x288xf32>
    %c0 = arith.constant 0 : index
    %c0_3 = arith.constant 0 : index
    %c0_4 = arith.constant 0 : index
    %20 = vector.load %arg1[%c0, %c0_3, %c0_4] : memref<1x3x342xf32, #tpu.memory_space<vmem>>, vector<1x1x288xf32>
    %21 = vector.shape_cast %20 : vector<1x1x288xf32> to vector<1x288xf32>
    %c0_5 = arith.constant 0 : index
    %c0_6 = arith.constant 0 : index
    %22 = vector.load %arg3[%c0_5, %c0_6] : memref<8x27xf32, #tpu.memory_space<vmem>>, vector<8x1xf32>
    %23 = vector.broadcast %22 : vector<8x1xf32> to vector<8x288xf32>
    %24 = vector.broadcast %21 : vector<1x288xf32> to vector<8x288xf32>
    %25 = arith.mulf %23, %24 : vector<8x288xf32>
    %26 = arith.addf %19, %25 : vector<8x288xf32>
    %c0_7 = arith.constant 0 : index
    %c1 = arith.constant 1 : index
    %c0_8 = arith.constant 0 : index
    %27 = vector.load %arg1[%c0_7, %c1, %c0_8] : memref<1x3x342xf32, #tpu.memory_space<vmem>>, vector<1x1x288xf32>
    %28 = vector.shape_cast %27 : vector<1x1x288xf32> to vector<1x288xf32>
    %c0_9 = arith.constant 0 : index
    %c1_10 = arith.constant 1 : index
    %29 = vector.load %arg3[%c0_9, %c1_10] : memref<8x27xf32, #tpu.memory_space<vmem>>, vector<8x1xf32>
    %30 = vector.broadcast %29 : vector<8x1xf32> to vector<8x288xf32>
    %31 = vector.broadcast %28 : vector<1x288xf32> to vector<8x288xf32>
    %32 = arith.mulf %30, %31 : vector<8x288xf32>
    %33 = arith.addf %26, %32 : vector<8x288xf32>
    %c0_11 = arith.constant 0 : index
    %c2 = arith.constant 2 : index
    %c0_12 = arith.constant 0 : index
    %34 = vector.load %arg1[%c0_11, %c2, %c0_12] : memref<1x3x342xf32, #tpu.memory_space<vmem>>, vector<1x1x288xf32>
    %35 = vector.shape_cast %34 : vector<1x1x288xf32> to vector<1x288xf32>
    %c0_13 = arith.constant 0 : index
    %c2_14 = arith.constant 2 : index
    %36 = vector.load %arg3[%c0_13, %c2_14] : memref<8x27xf32, #tpu.memory_space<vmem>>, vector<8x1xf32>
    %37 = vector.broadcast %36 : vector<8x1xf32> to vector<8x288xf32>
    %38 = vector.broadcast %35 : vector<1x288xf32> to vector<8x288xf32>
    %39 = arith.mulf %37, %38 : vector<8x288xf32>
    %40 = arith.addf %33, %39 : vector<8x288xf32>
    %c0_15 = arith.constant 0 : index
    %c0_16 = arith.constant 0 : index
    %c1_17 = arith.constant 1 : index
    %41 = vector.load %arg1[%c0_15, %c0_16, %c1_17] : memref<1x3x342xf32, #tpu.memory_space<vmem>>, vector<1x1x288xf32>
    %42 = vector.shape_cast %41 : vector<1x1x288xf32> to vector<1x288xf32>
    %c0_18 = arith.constant 0 : index
    %c3 = arith.constant 3 : index
    %43 = vector.load %arg3[%c0_18, %c3] : memref<8x27xf32, #tpu.memory_space<vmem>>, vector<8x1xf32>
    %44 = vector.broadcast %43 : vector<8x1xf32> to vector<8x288xf32>
    %45 = vector.broadcast %42 : vector<1x288xf32> to vector<8x288xf32>
    %46 = arith.mulf %44, %45 : vector<8x288xf32>
    %47 = arith.addf %40, %46 : vector<8x288xf32>
    %c0_19 = arith.constant 0 : index
    %c1_20 = arith.constant 1 : index
    %c1_21 = arith.constant 1 : index
    %48 = vector.load %arg1[%c0_19, %c1_20, %c1_21] : memref<1x3x342xf32, #tpu.memory_space<vmem>>, vector<1x1x288xf32>
    %49 = vector.shape_cast %48 : vector<1x1x288xf32> to vector<1x288xf32>
    %c0_22 = arith.constant 0 : index
    %c4 = arith.constant 4 : index
    %50 = vector.load %arg3[%c0_22, %c4] : memref<8x27xf32, #tpu.memory_space<vmem>>, vector<8x1xf32>
    %51 = vector.broadcast %50 : vector<8x1xf32> to vector<8x288xf32>
    %52 = vector.broadcast %49 : vector<1x288xf32> to vector<8x288xf32>
    %53 = arith.mulf %51, %52 : vector<8x288xf32>
    %54 = arith.addf %47, %53 : vector<8x288xf32>
    %c0_23 = arith.constant 0 : index
    %c2_24 = arith.constant 2 : index
    %c1_25 = arith.constant 1 : index
    %55 = vector.load %arg1[%c0_23, %c2_24, %c1_25] : memref<1x3x342xf32, #tpu.memory_space<vmem>>, vector<1x1x288xf32>
    %56 = vector.shape_cast %55 : vector<1x1x288xf32> to vector<1x288xf32>
    %c0_26 = arith.constant 0 : index
    %c5 = arith.constant 5 : index
    %57 = vector.load %arg3[%c0_26, %c5] : memref<8x27xf32, #tpu.memory_space<vmem>>, vector<8x1xf32>
    %58 = vector.broadcast %57 : vector<8x1xf32> to vector<8x288xf32>
    %59 = vector.broadcast %56 : vector<1x288xf32> to vector<8x288xf32>
    %60 = arith.mulf %58, %59 : vector<8x288xf32>
    %61 = arith.addf %54, %60 : vector<8x288xf32>
    %c0_27 = arith.constant 0 : index
    %c0_28 = arith.constant 0 : index
    %c2_29 = arith.constant 2 : index
    %62 = vector.load %arg1[%c0_27, %c0_28, %c2_29] : memref<1x3x342xf32, #tpu.memory_space<vmem>>, vector<1x1x288xf32>
    %63 = vector.shape_cast %62 : vector<1x1x288xf32> to vector<1x288xf32>
    %c0_30 = arith.constant 0 : index
    %c6 = arith.constant 6 : index
    %64 = vector.load %arg3[%c0_30, %c6] : memref<8x27xf32, #tpu.memory_space<vmem>>, vector<8x1xf32>
    %65 = vector.broadcast %64 : vector<8x1xf32> to vector<8x288xf32>
    %66 = vector.broadcast %63 : vector<1x288xf32> to vector<8x288xf32>
    %67 = arith.mulf %65, %66 : vector<8x288xf32>
    %68 = arith.addf %61, %67 : vector<8x288xf32>
    %c0_31 = arith.constant 0 : index
    %c1_32 = arith.constant 1 : index
    %c2_33 = arith.constant 2 : index
    %69 = vector.load %arg1[%c0_31, %c1_32, %c2_33] : memref<1x3x342xf32, #tpu.memory_space<vmem>>, vector<1x1x288xf32>
    %70 = vector.shape_cast %69 : vector<1x1x288xf32> to vector<1x288xf32>
    %c0_34 = arith.constant 0 : index
    %c7 = arith.constant 7 : index
    %71 = vector.load %arg3[%c0_34, %c7] : memref<8x27xf32, #tpu.memory_space<vmem>>, vector<8x1xf32>
    %72 = vector.broadcast %71 : vector<8x1xf32> to vector<8x288xf32>
    %73 = vector.broadcast %70 : vector<1x288xf32> to vector<8x288xf32>
    %74 = arith.mulf %72, %73 : vector<8x288xf32>
    %75 = arith.addf %68, %74 : vector<8x288xf32>
    %c0_35 = arith.constant 0 : index
    %c2_36 = arith.constant 2 : index
    %c2_37 = arith.constant 2 : index
    %76 = vector.load %arg1[%c0_35, %c2_36, %c2_37] : memref<1x3x342xf32, #tpu.memory_space<vmem>>, vector<1x1x288xf32>
    %77 = vector.shape_cast %76 : vector<1x1x288xf32> to vector<1x288xf32>
    %c0_38 = arith.constant 0 : index
    %c8 = arith.constant 8 : index
    %78 = vector.load %arg3[%c0_38, %c8] : memref<8x27xf32, #tpu.memory_space<vmem>>, vector<8x1xf32>
    %79 = vector.broadcast %78 : vector<8x1xf32> to vector<8x288xf32>
    %80 = vector.broadcast %77 : vector<1x288xf32> to vector<8x288xf32>
    %81 = arith.mulf %79, %80 : vector<8x288xf32>
    %82 = arith.addf %75, %81 : vector<8x288xf32>
    %c0_39 = arith.constant 0 : index
    %c0_40 = arith.constant 0 : index
    %c18 = arith.constant 18 : index
    %83 = vector.load %arg1[%c0_39, %c0_40, %c18] : memref<1x3x342xf32, #tpu.memory_space<vmem>>, vector<1x1x288xf32>
    %84 = vector.shape_cast %83 : vector<1x1x288xf32> to vector<1x288xf32>
    %c0_41 = arith.constant 0 : index
    %c9 = arith.constant 9 : index
    %85 = vector.load %arg3[%c0_41, %c9] : memref<8x27xf32, #tpu.memory_space<vmem>>, vector<8x1xf32>
    %86 = vector.broadcast %85 : vector<8x1xf32> to vector<8x288xf32>
    %87 = vector.broadcast %84 : vector<1x288xf32> to vector<8x288xf32>
    %88 = arith.mulf %86, %87 : vector<8x288xf32>
    %89 = arith.addf %82, %88 : vector<8x288xf32>
    %c0_42 = arith.constant 0 : index
    %c1_43 = arith.constant 1 : index
    %c18_44 = arith.constant 18 : index
    %90 = vector.load %arg1[%c0_42, %c1_43, %c18_44] : memref<1x3x342xf32, #tpu.memory_space<vmem>>, vector<1x1x288xf32>
    %91 = vector.shape_cast %90 : vector<1x1x288xf32> to vector<1x288xf32>
    %c0_45 = arith.constant 0 : index
    %c10 = arith.constant 10 : index
    %92 = vector.load %arg3[%c0_45, %c10] : memref<8x27xf32, #tpu.memory_space<vmem>>, vector<8x1xf32>
    %93 = vector.broadcast %92 : vector<8x1xf32> to vector<8x288xf32>
    %94 = vector.broadcast %91 : vector<1x288xf32> to vector<8x288xf32>
    %95 = arith.mulf %93, %94 : vector<8x288xf32>
    %96 = arith.addf %89, %95 : vector<8x288xf32>
    %c0_46 = arith.constant 0 : index
    %c2_47 = arith.constant 2 : index
    %c18_48 = arith.constant 18 : index
    %97 = vector.load %arg1[%c0_46, %c2_47, %c18_48] : memref<1x3x342xf32, #tpu.memory_space<vmem>>, vector<1x1x288xf32>
    %98 = vector.shape_cast %97 : vector<1x1x288xf32> to vector<1x288xf32>
    %c0_49 = arith.constant 0 : index
    %c11 = arith.constant 11 : index
    %99 = vector.load %arg3[%c0_49, %c11] : memref<8x27xf32, #tpu.memory_space<vmem>>, vector<8x1xf32>
    %100 = vector.broadcast %99 : vector<8x1xf32> to vector<8x288xf32>
    %101 = vector.broadcast %98 : vector<1x288xf32> to vector<8x288xf32>
    %102 = arith.mulf %100, %101 : vector<8x288xf32>
    %103 = arith.addf %96, %102 : vector<8x288xf32>
    %c0_50 = arith.constant 0 : index
    %c0_51 = arith.constant 0 : index
    %c19 = arith.constant 19 : index
    %104 = vector.load %arg1[%c0_50, %c0_51, %c19] : memref<1x3x342xf32, #tpu.memory_space<vmem>>, vector<1x1x288xf32>
    %105 = vector.shape_cast %104 : vector<1x1x288xf32> to vector<1x288xf32>
    %c0_52 = arith.constant 0 : index
    %c12 = arith.constant 12 : index
    %106 = vector.load %arg3[%c0_52, %c12] : memref<8x27xf32, #tpu.memory_space<vmem>>, vector<8x1xf32>
    %107 = vector.broadcast %106 : vector<8x1xf32> to vector<8x288xf32>
    %108 = vector.broadcast %105 : vector<1x288xf32> to vector<8x288xf32>
    %109 = arith.mulf %107, %108 : vector<8x288xf32>
    %110 = arith.addf %103, %109 : vector<8x288xf32>
    %c0_53 = arith.constant 0 : index
    %c1_54 = arith.constant 1 : index
    %c19_55 = arith.constant 19 : index
    %111 = vector.load %arg1[%c0_53, %c1_54, %c19_55] : memref<1x3x342xf32, #tpu.memory_space<vmem>>, vector<1x1x288xf32>
    %112 = vector.shape_cast %111 : vector<1x1x288xf32> to vector<1x288xf32>
    %c0_56 = arith.constant 0 : index
    %c13 = arith.constant 13 : index
    %113 = vector.load %arg3[%c0_56, %c13] : memref<8x27xf32, #tpu.memory_space<vmem>>, vector<8x1xf32>
    %114 = vector.broadcast %113 : vector<8x1xf32> to vector<8x288xf32>
    %115 = vector.broadcast %112 : vector<1x288xf32> to vector<8x288xf32>
    %116 = arith.mulf %114, %115 : vector<8x288xf32>
    %117 = arith.addf %110, %116 : vector<8x288xf32>
    %c0_57 = arith.constant 0 : index
    %c2_58 = arith.constant 2 : index
    %c19_59 = arith.constant 19 : index
    %118 = vector.load %arg1[%c0_57, %c2_58, %c19_59] : memref<1x3x342xf32, #tpu.memory_space<vmem>>, vector<1x1x288xf32>
    %119 = vector.shape_cast %118 : vector<1x1x288xf32> to vector<1x288xf32>
    %c0_60 = arith.constant 0 : index
    %c14 = arith.constant 14 : index
    %120 = vector.load %arg3[%c0_60, %c14] : memref<8x27xf32, #tpu.memory_space<vmem>>, vector<8x1xf32>
    %121 = vector.broadcast %120 : vector<8x1xf32> to vector<8x288xf32>
    %122 = vector.broadcast %119 : vector<1x288xf32> to vector<8x288xf32>
    %123 = arith.mulf %121, %122 : vector<8x288xf32>
    %124 = arith.addf %117, %123 : vector<8x288xf32>
    %c0_61 = arith.constant 0 : index
    %c0_62 = arith.constant 0 : index
    %c20 = arith.constant 20 : index
    %125 = vector.load %arg1[%c0_61, %c0_62, %c20] : memref<1x3x342xf32, #tpu.memory_space<vmem>>, vector<1x1x288xf32>
    %126 = vector.shape_cast %125 : vector<1x1x288xf32> to vector<1x288xf32>
    %c0_63 = arith.constant 0 : index
    %c15 = arith.constant 15 : index
    %127 = vector.load %arg3[%c0_63, %c15] : memref<8x27xf32, #tpu.memory_space<vmem>>, vector<8x1xf32>
    %128 = vector.broadcast %127 : vector<8x1xf32> to vector<8x288xf32>
    %129 = vector.broadcast %126 : vector<1x288xf32> to vector<8x288xf32>
    %130 = arith.mulf %128, %129 : vector<8x288xf32>
    %131 = arith.addf %124, %130 : vector<8x288xf32>
    %c0_64 = arith.constant 0 : index
    %c1_65 = arith.constant 1 : index
    %c20_66 = arith.constant 20 : index
    %132 = vector.load %arg1[%c0_64, %c1_65, %c20_66] : memref<1x3x342xf32, #tpu.memory_space<vmem>>, vector<1x1x288xf32>
    %133 = vector.shape_cast %132 : vector<1x1x288xf32> to vector<1x288xf32>
    %c0_67 = arith.constant 0 : index
    %c16 = arith.constant 16 : index
    %134 = vector.load %arg3[%c0_67, %c16] : memref<8x27xf32, #tpu.memory_space<vmem>>, vector<8x1xf32>
    %135 = vector.broadcast %134 : vector<8x1xf32> to vector<8x288xf32>
    %136 = vector.broadcast %133 : vector<1x288xf32> to vector<8x288xf32>
    %137 = arith.mulf %135, %136 : vector<8x288xf32>
    %138 = arith.addf %131, %137 : vector<8x288xf32>
    %c0_68 = arith.constant 0 : index
    %c2_69 = arith.constant 2 : index
    %c20_70 = arith.constant 20 : index
    %139 = vector.load %arg1[%c0_68, %c2_69, %c20_70] : memref<1x3x342xf32, #tpu.memory_space<vmem>>, vector<1x1x288xf32>
    %140 = vector.shape_cast %139 : vector<1x1x288xf32> to vector<1x288xf32>
    %c0_71 = arith.constant 0 : index
    %c17 = arith.constant 17 : index
    %141 = vector.load %arg3[%c0_71, %c17] : memref<8x27xf32, #tpu.memory_space<vmem>>, vector<8x1xf32>
    %142 = vector.broadcast %141 : vector<8x1xf32> to vector<8x288xf32>
    %143 = vector.broadcast %140 : vector<1x288xf32> to vector<8x288xf32>
    %144 = arith.mulf %142, %143 : vector<8x288xf32>
    %145 = arith.addf %138, %144 : vector<8x288xf32>
    %c0_72 = arith.constant 0 : index
    %c0_73 = arith.constant 0 : index
    %c36 = arith.constant 36 : index
    %146 = vector.load %arg1[%c0_72, %c0_73, %c36] : memref<1x3x342xf32, #tpu.memory_space<vmem>>, vector<1x1x288xf32>
    %147 = vector.shape_cast %146 : vector<1x1x288xf32> to vector<1x288xf32>
    %c0_74 = arith.constant 0 : index
    %c18_75 = arith.constant 18 : index
    %148 = vector.load %arg3[%c0_74, %c18_75] : memref<8x27xf32, #tpu.memory_space<vmem>>, vector<8x1xf32>
    %149 = vector.broadcast %148 : vector<8x1xf32> to vector<8x288xf32>
    %150 = vector.broadcast %147 : vector<1x288xf32> to vector<8x288xf32>
    %151 = arith.mulf %149, %150 : vector<8x288xf32>
    %152 = arith.addf %145, %151 : vector<8x288xf32>
    %c0_76 = arith.constant 0 : index
    %c1_77 = arith.constant 1 : index
    %c36_78 = arith.constant 36 : index
    %153 = vector.load %arg1[%c0_76, %c1_77, %c36_78] : memref<1x3x342xf32, #tpu.memory_space<vmem>>, vector<1x1x288xf32>
    %154 = vector.shape_cast %153 : vector<1x1x288xf32> to vector<1x288xf32>
    %c0_79 = arith.constant 0 : index
    %c19_80 = arith.constant 19 : index
    %155 = vector.load %arg3[%c0_79, %c19_80] : memref<8x27xf32, #tpu.memory_space<vmem>>, vector<8x1xf32>
    %156 = vector.broadcast %155 : vector<8x1xf32> to vector<8x288xf32>
    %157 = vector.broadcast %154 : vector<1x288xf32> to vector<8x288xf32>
    %158 = arith.mulf %156, %157 : vector<8x288xf32>
    %159 = arith.addf %152, %158 : vector<8x288xf32>
    %c0_81 = arith.constant 0 : index
    %c2_82 = arith.constant 2 : index
    %c36_83 = arith.constant 36 : index
    %160 = vector.load %arg1[%c0_81, %c2_82, %c36_83] : memref<1x3x342xf32, #tpu.memory_space<vmem>>, vector<1x1x288xf32>
    %161 = vector.shape_cast %160 : vector<1x1x288xf32> to vector<1x288xf32>
    %c0_84 = arith.constant 0 : index
    %c20_85 = arith.constant 20 : index
    %162 = vector.load %arg3[%c0_84, %c20_85] : memref<8x27xf32, #tpu.memory_space<vmem>>, vector<8x1xf32>
    %163 = vector.broadcast %162 : vector<8x1xf32> to vector<8x288xf32>
    %164 = vector.broadcast %161 : vector<1x288xf32> to vector<8x288xf32>
    %165 = arith.mulf %163, %164 : vector<8x288xf32>
    %166 = arith.addf %159, %165 : vector<8x288xf32>
    %c0_86 = arith.constant 0 : index
    %c0_87 = arith.constant 0 : index
    %c37 = arith.constant 37 : index
    %167 = vector.load %arg1[%c0_86, %c0_87, %c37] : memref<1x3x342xf32, #tpu.memory_space<vmem>>, vector<1x1x288xf32>
    %168 = vector.shape_cast %167 : vector<1x1x288xf32> to vector<1x288xf32>
    %c0_88 = arith.constant 0 : index
    %c21 = arith.constant 21 : index
    %169 = vector.load %arg3[%c0_88, %c21] : memref<8x27xf32, #tpu.memory_space<vmem>>, vector<8x1xf32>
    %170 = vector.broadcast %169 : vector<8x1xf32> to vector<8x288xf32>
    %171 = vector.broadcast %168 : vector<1x288xf32> to vector<8x288xf32>
    %172 = arith.mulf %170, %171 : vector<8x288xf32>
    %173 = arith.addf %166, %172 : vector<8x288xf32>
    %c0_89 = arith.constant 0 : index
    %c1_90 = arith.constant 1 : index
    %c37_91 = arith.constant 37 : index
    %174 = vector.load %arg1[%c0_89, %c1_90, %c37_91] : memref<1x3x342xf32, #tpu.memory_space<vmem>>, vector<1x1x288xf32>
    %175 = vector.shape_cast %174 : vector<1x1x288xf32> to vector<1x288xf32>
    %c0_92 = arith.constant 0 : index
    %c22 = arith.constant 22 : index
    %176 = vector.load %arg3[%c0_92, %c22] : memref<8x27xf32, #tpu.memory_space<vmem>>, vector<8x1xf32>
    %177 = vector.broadcast %176 : vector<8x1xf32> to vector<8x288xf32>
    %178 = vector.broadcast %175 : vector<1x288xf32> to vector<8x288xf32>
    %179 = arith.mulf %177, %178 : vector<8x288xf32>
    %180 = arith.addf %173, %179 : vector<8x288xf32>
    %c0_93 = arith.constant 0 : index
    %c2_94 = arith.constant 2 : index
    %c37_95 = arith.constant 37 : index
    %181 = vector.load %arg1[%c0_93, %c2_94, %c37_95] : memref<1x3x342xf32, #tpu.memory_space<vmem>>, vector<1x1x288xf32>
    %182 = vector.shape_cast %181 : vector<1x1x288xf32> to vector<1x288xf32>
    %c0_96 = arith.constant 0 : index
    %c23 = arith.constant 23 : index
    %183 = vector.load %arg3[%c0_96, %c23] : memref<8x27xf32, #tpu.memory_space<vmem>>, vector<8x1xf32>
    %184 = vector.broadcast %183 : vector<8x1xf32> to vector<8x288xf32>
    %185 = vector.broadcast %182 : vector<1x288xf32> to vector<8x288xf32>
    %186 = arith.mulf %184, %185 : vector<8x288xf32>
    %187 = arith.addf %180, %186 : vector<8x288xf32>
    %c0_97 = arith.constant 0 : index
    %c0_98 = arith.constant 0 : index
    %c38 = arith.constant 38 : index
    %188 = vector.load %arg1[%c0_97, %c0_98, %c38] : memref<1x3x342xf32, #tpu.memory_space<vmem>>, vector<1x1x288xf32>
    %189 = vector.shape_cast %188 : vector<1x1x288xf32> to vector<1x288xf32>
    %c0_99 = arith.constant 0 : index
    %c24 = arith.constant 24 : index
    %190 = vector.load %arg3[%c0_99, %c24] : memref<8x27xf32, #tpu.memory_space<vmem>>, vector<8x1xf32>
    %191 = vector.broadcast %190 : vector<8x1xf32> to vector<8x288xf32>
    %192 = vector.broadcast %189 : vector<1x288xf32> to vector<8x288xf32>
    %193 = arith.mulf %191, %192 : vector<8x288xf32>
    %194 = arith.addf %187, %193 : vector<8x288xf32>
    %c0_100 = arith.constant 0 : index
    %c1_101 = arith.constant 1 : index
    %c38_102 = arith.constant 38 : index
    %195 = vector.load %arg1[%c0_100, %c1_101, %c38_102] : memref<1x3x342xf32, #tpu.memory_space<vmem>>, vector<1x1x288xf32>
    %196 = vector.shape_cast %195 : vector<1x1x288xf32> to vector<1x288xf32>
    %c0_103 = arith.constant 0 : index
    %c25 = arith.constant 25 : index
    %197 = vector.load %arg3[%c0_103, %c25] : memref<8x27xf32, #tpu.memory_space<vmem>>, vector<8x1xf32>
    %198 = vector.broadcast %197 : vector<8x1xf32> to vector<8x288xf32>
    %199 = vector.broadcast %196 : vector<1x288xf32> to vector<8x288xf32>
    %200 = arith.mulf %198, %199 : vector<8x288xf32>
    %201 = arith.addf %194, %200 : vector<8x288xf32>
    %c0_104 = arith.constant 0 : index
    %c2_105 = arith.constant 2 : index
    %c38_106 = arith.constant 38 : index
    %202 = vector.load %arg1[%c0_104, %c2_105, %c38_106] : memref<1x3x342xf32, #tpu.memory_space<vmem>>, vector<1x1x288xf32>
    %203 = vector.shape_cast %202 : vector<1x1x288xf32> to vector<1x288xf32>
    %c0_107 = arith.constant 0 : index
    %c26 = arith.constant 26 : index
    %204 = vector.load %arg3[%c0_107, %c26] : memref<8x27xf32, #tpu.memory_space<vmem>>, vector<8x1xf32>
    %205 = vector.broadcast %204 : vector<8x1xf32> to vector<8x288xf32>
    %206 = vector.broadcast %203 : vector<1x288xf32> to vector<8x288xf32>
    %207 = arith.mulf %205, %206 : vector<8x288xf32>
    %208 = arith.addf %201, %207 : vector<8x288xf32>
    %c0_108 = arith.constant 0 : index
    %c0_109 = arith.constant 0 : index
    %209 = vector.load %arg4[%c0_108, %c0_109] : memref<8x1xf32, #tpu.memory_space<vmem>>, vector<8x1xf32>
    %210 = vector.broadcast %209 : vector<8x1xf32> to vector<8x288xf32>
    %211 = arith.addf %208, %210 : vector<8x288xf32>
    %cst_110 = arith.constant 0.000000e+00 : f32
    %212 = vector.broadcast %cst_110 : f32 to vector<8x288xf32>
    %213 = arith.maximumf %211, %212 : vector<8x288xf32>
    %cst_111 = arith.constant 0.000000e+00 : f32
    %214 = vector.shape_cast %18 : vector<1x288xi1> to vector<1x288xi1>
    %215 = vector.broadcast %214 : vector<1x288xi1> to vector<8x288xi1>
    %216 = vector.broadcast %cst_111 : f32 to vector<8x288xf32>
    %217 = arith.select %215, %213, %216 : vector<8x288xi1>, vector<8x288xf32>
    %cst_112 = arith.constant 0.000000e+00 : f32
    %218 = vector.broadcast %cst_112 : f32 to vector<8x288xf32>
    %c0_113 = arith.constant 0 : index
    %c0_114 = arith.constant 0 : index
    %c0_115 = arith.constant 0 : index
    %219 = vector.load %arg2[%c0_113, %c0_114, %c0_115] : memref<1x1x342xf32, #tpu.memory_space<vmem>>, vector<1x1x288xf32>
    %220 = vector.shape_cast %219 : vector<1x1x288xf32> to vector<1x288xf32>
    %c0_116 = arith.constant 0 : index
    %c0_117 = arith.constant 0 : index
    %221 = vector.load %arg5[%c0_116, %c0_117] : memref<8x9xf32, #tpu.memory_space<vmem>>, vector<8x1xf32>
    %222 = vector.broadcast %221 : vector<8x1xf32> to vector<8x288xf32>
    %223 = vector.broadcast %220 : vector<1x288xf32> to vector<8x288xf32>
    %224 = arith.mulf %222, %223 : vector<8x288xf32>
    %225 = arith.addf %218, %224 : vector<8x288xf32>
    %c0_118 = arith.constant 0 : index
    %c0_119 = arith.constant 0 : index
    %c1_120 = arith.constant 1 : index
    %226 = vector.load %arg2[%c0_118, %c0_119, %c1_120] : memref<1x1x342xf32, #tpu.memory_space<vmem>>, vector<1x1x288xf32>
    %227 = vector.shape_cast %226 : vector<1x1x288xf32> to vector<1x288xf32>
    %c0_121 = arith.constant 0 : index
    %c1_122 = arith.constant 1 : index
    %228 = vector.load %arg5[%c0_121, %c1_122] : memref<8x9xf32, #tpu.memory_space<vmem>>, vector<8x1xf32>
    %229 = vector.broadcast %228 : vector<8x1xf32> to vector<8x288xf32>
    %230 = vector.broadcast %227 : vector<1x288xf32> to vector<8x288xf32>
    %231 = arith.mulf %229, %230 : vector<8x288xf32>
    %232 = arith.addf %225, %231 : vector<8x288xf32>
    %c0_123 = arith.constant 0 : index
    %c0_124 = arith.constant 0 : index
    %c2_125 = arith.constant 2 : index
    %233 = vector.load %arg2[%c0_123, %c0_124, %c2_125] : memref<1x1x342xf32, #tpu.memory_space<vmem>>, vector<1x1x288xf32>
    %234 = vector.shape_cast %233 : vector<1x1x288xf32> to vector<1x288xf32>
    %c0_126 = arith.constant 0 : index
    %c2_127 = arith.constant 2 : index
    %235 = vector.load %arg5[%c0_126, %c2_127] : memref<8x9xf32, #tpu.memory_space<vmem>>, vector<8x1xf32>
    %236 = vector.broadcast %235 : vector<8x1xf32> to vector<8x288xf32>
    %237 = vector.broadcast %234 : vector<1x288xf32> to vector<8x288xf32>
    %238 = arith.mulf %236, %237 : vector<8x288xf32>
    %239 = arith.addf %232, %238 : vector<8x288xf32>
    %c0_128 = arith.constant 0 : index
    %c0_129 = arith.constant 0 : index
    %c18_130 = arith.constant 18 : index
    %240 = vector.load %arg2[%c0_128, %c0_129, %c18_130] : memref<1x1x342xf32, #tpu.memory_space<vmem>>, vector<1x1x288xf32>
    %241 = vector.shape_cast %240 : vector<1x1x288xf32> to vector<1x288xf32>
    %c0_131 = arith.constant 0 : index
    %c3_132 = arith.constant 3 : index
    %242 = vector.load %arg5[%c0_131, %c3_132] : memref<8x9xf32, #tpu.memory_space<vmem>>, vector<8x1xf32>
    %243 = vector.broadcast %242 : vector<8x1xf32> to vector<8x288xf32>
    %244 = vector.broadcast %241 : vector<1x288xf32> to vector<8x288xf32>
    %245 = arith.mulf %243, %244 : vector<8x288xf32>
    %246 = arith.addf %239, %245 : vector<8x288xf32>
    %c0_133 = arith.constant 0 : index
    %c0_134 = arith.constant 0 : index
    %c19_135 = arith.constant 19 : index
    %247 = vector.load %arg2[%c0_133, %c0_134, %c19_135] : memref<1x1x342xf32, #tpu.memory_space<vmem>>, vector<1x1x288xf32>
    %248 = vector.shape_cast %247 : vector<1x1x288xf32> to vector<1x288xf32>
    %c0_136 = arith.constant 0 : index
    %c4_137 = arith.constant 4 : index
    %249 = vector.load %arg5[%c0_136, %c4_137] : memref<8x9xf32, #tpu.memory_space<vmem>>, vector<8x1xf32>
    %250 = vector.broadcast %249 : vector<8x1xf32> to vector<8x288xf32>
    %251 = vector.broadcast %248 : vector<1x288xf32> to vector<8x288xf32>
    %252 = arith.mulf %250, %251 : vector<8x288xf32>
    %253 = arith.addf %246, %252 : vector<8x288xf32>
    %c0_138 = arith.constant 0 : index
    %c0_139 = arith.constant 0 : index
    %c20_140 = arith.constant 20 : index
    %254 = vector.load %arg2[%c0_138, %c0_139, %c20_140] : memref<1x1x342xf32, #tpu.memory_space<vmem>>, vector<1x1x288xf32>
    %255 = vector.shape_cast %254 : vector<1x1x288xf32> to vector<1x288xf32>
    %c0_141 = arith.constant 0 : index
    %c5_142 = arith.constant 5 : index
    %256 = vector.load %arg5[%c0_141, %c5_142] : memref<8x9xf32, #tpu.memory_space<vmem>>, vector<8x1xf32>
    %257 = vector.broadcast %256 : vector<8x1xf32> to vector<8x288xf32>
    %258 = vector.broadcast %255 : vector<1x288xf32> to vector<8x288xf32>
    %259 = arith.mulf %257, %258 : vector<8x288xf32>
    %260 = arith.addf %253, %259 : vector<8x288xf32>
    %c0_143 = arith.constant 0 : index
    %c0_144 = arith.constant 0 : index
    %c36_145 = arith.constant 36 : index
    %261 = vector.load %arg2[%c0_143, %c0_144, %c36_145] : memref<1x1x342xf32, #tpu.memory_space<vmem>>, vector<1x1x288xf32>
    %262 = vector.shape_cast %261 : vector<1x1x288xf32> to vector<1x288xf32>
    %c0_146 = arith.constant 0 : index
    %c6_147 = arith.constant 6 : index
    %263 = vector.load %arg5[%c0_146, %c6_147] : memref<8x9xf32, #tpu.memory_space<vmem>>, vector<8x1xf32>
    %264 = vector.broadcast %263 : vector<8x1xf32> to vector<8x288xf32>
    %265 = vector.broadcast %262 : vector<1x288xf32> to vector<8x288xf32>
    %266 = arith.mulf %264, %265 : vector<8x288xf32>
    %267 = arith.addf %260, %266 : vector<8x288xf32>
    %c0_148 = arith.constant 0 : index
    %c0_149 = arith.constant 0 : index
    %c37_150 = arith.constant 37 : index
    %268 = vector.load %arg2[%c0_148, %c0_149, %c37_150] : memref<1x1x342xf32, #tpu.memory_space<vmem>>, vector<1x1x288xf32>
    %269 = vector.shape_cast %268 : vector<1x1x288xf32> to vector<1x288xf32>
    %c0_151 = arith.constant 0 : index
    %c7_152 = arith.constant 7 : index
    %270 = vector.load %arg5[%c0_151, %c7_152] : memref<8x9xf32, #tpu.memory_space<vmem>>, vector<8x1xf32>
    %271 = vector.broadcast %270 : vector<8x1xf32> to vector<8x288xf32>
    %272 = vector.broadcast %269 : vector<1x288xf32> to vector<8x288xf32>
    %273 = arith.mulf %271, %272 : vector<8x288xf32>
    %274 = arith.addf %267, %273 : vector<8x288xf32>
    %c0_153 = arith.constant 0 : index
    %c0_154 = arith.constant 0 : index
    %c38_155 = arith.constant 38 : index
    %275 = vector.load %arg2[%c0_153, %c0_154, %c38_155] : memref<1x1x342xf32, #tpu.memory_space<vmem>>, vector<1x1x288xf32>
    %276 = vector.shape_cast %275 : vector<1x1x288xf32> to vector<1x288xf32>
    %c0_156 = arith.constant 0 : index
    %c8_157 = arith.constant 8 : index
    %277 = vector.load %arg5[%c0_156, %c8_157] : memref<8x9xf32, #tpu.memory_space<vmem>>, vector<8x1xf32>
    %278 = vector.broadcast %277 : vector<8x1xf32> to vector<8x288xf32>
    %279 = vector.broadcast %276 : vector<1x288xf32> to vector<8x288xf32>
    %280 = arith.mulf %278, %279 : vector<8x288xf32>
    %281 = arith.addf %274, %280 : vector<8x288xf32>
    %c0_158 = arith.constant 0 : index
    %c0_159 = arith.constant 0 : index
    %282 = vector.load %arg6[%c0_158, %c0_159] : memref<8x1xf32, #tpu.memory_space<vmem>>, vector<8x1xf32>
    %283 = vector.broadcast %282 : vector<8x1xf32> to vector<8x288xf32>
    %284 = arith.addf %281, %283 : vector<8x288xf32>
    %cst_160 = arith.constant 0.000000e+00 : f32
    %285 = vector.broadcast %cst_160 : f32 to vector<8x288xf32>
    %286 = arith.maximumf %284, %285 : vector<8x288xf32>
    %cst_161 = arith.constant 0.000000e+00 : f32
    %287 = vector.shape_cast %18 : vector<1x288xi1> to vector<1x288xi1>
    %288 = vector.broadcast %287 : vector<1x288xi1> to vector<8x288xi1>
    %289 = vector.broadcast %cst_161 : f32 to vector<8x288xf32>
    %290 = arith.select %288, %286, %289 : vector<8x288xi1>, vector<8x288xf32>
    %cst_162 = arith.constant 0.000000e+00 : f32
    %291 = vector.broadcast %cst_162 : f32 to vector<16x342xf32>
    %c0_163 = arith.constant 0 : index
    %c0_164 = arith.constant 0 : index
    %292 = vector.load %arg11[%c0_163, %c0_164] : memref<16x342xf32, #tpu.memory_space<vmem>>, vector<16x342xf32>
    tpu.vector_store %arg11[%c0_163, %c0_164], %291 {strides = array<i32>} : memref<16x342xf32, #tpu.memory_space<vmem>>, vector<16x342xf32>,
    %c0_165 = arith.constant 0 : index
    %c19_166 = arith.constant 19 : index
    %293 = vector.load %arg11[%c0_165, %c19_166] : memref<16x342xf32, #tpu.memory_space<vmem>>, vector<8x288xf32>
    tpu.vector_store %arg11[%c0_165, %c19_166], %217 {strides = array<i32>} : memref<16x342xf32, #tpu.memory_space<vmem>>, vector<8x288xf32>,
    %c8_167 = arith.constant 8 : index
    %c19_168 = arith.constant 19 : index
    %294 = vector.load %arg11[%c8_167, %c19_168] : memref<16x342xf32, #tpu.memory_space<vmem>>, vector<8x288xf32>
    tpu.vector_store %arg11[%c8_167, %c19_168], %290 {strides = array<i32>} : memref<16x342xf32, #tpu.memory_space<vmem>>, vector<8x288xf32>,
    %cst_169 = arith.constant 0.000000e+00 : f32
    %295 = vector.broadcast %cst_169 : f32 to vector<32x288xf32>
    %c0_170 = arith.constant 0 : index
    %c0_171 = arith.constant 0 : index
    %296 = vector.load %arg11[%c0_170, %c0_171] : memref<16x342xf32, #tpu.memory_space<vmem>>, vector<16x288xf32>
    %c0_172 = arith.constant 0 : index
    %c0_173 = arith.constant 0 : index
    %297 = vector.load %arg7[%c0_172, %c0_173] : memref<288x16xf32, #tpu.memory_space<vmem>>, vector<32x16xf32>
    %cst_174 = arith.constant dense<0.000000e+00> : vector<32x288xf32>
    %298 = tpu.matmul %297, %296, %cst_174 {dimension_numbers = #tpu.dot_dimension_numbers<[1], [0], [0], [1], [0, 0, 1, 1], [], []>} : vector<32x16xf32>, vector<16x288xf32>, vector<32x288xf32> -> vector<32x288xf32>
    %299 = arith.addf %295, %298 : vector<32x288xf32>
    %c0_175 = arith.constant 0 : index
    %c1_176 = arith.constant 1 : index
    %300 = vector.load %arg11[%c0_175, %c1_176] : memref<16x342xf32, #tpu.memory_space<vmem>>, vector<16x288xf32>
    %c32 = arith.constant 32 : index
    %c0_177 = arith.constant 0 : index
    %301 = vector.load %arg7[%c32, %c0_177] : memref<288x16xf32, #tpu.memory_space<vmem>>, vector<32x16xf32>
    %cst_178 = arith.constant dense<0.000000e+00> : vector<32x288xf32>
    %302 = tpu.matmul %301, %300, %cst_178 {dimension_numbers = #tpu.dot_dimension_numbers<[1], [0], [0], [1], [0, 0, 1, 1], [], []>} : vector<32x16xf32>, vector<16x288xf32>, vector<32x288xf32> -> vector<32x288xf32>
    %303 = arith.addf %299, %302 : vector<32x288xf32>
    %c0_179 = arith.constant 0 : index
    %c2_180 = arith.constant 2 : index
    %304 = vector.load %arg11[%c0_179, %c2_180] : memref<16x342xf32, #tpu.memory_space<vmem>>, vector<16x288xf32>
    %c64 = arith.constant 64 : index
    %c0_181 = arith.constant 0 : index
    %305 = vector.load %arg7[%c64, %c0_181] : memref<288x16xf32, #tpu.memory_space<vmem>>, vector<32x16xf32>
    %cst_182 = arith.constant dense<0.000000e+00> : vector<32x288xf32>
    %306 = tpu.matmul %305, %304, %cst_182 {dimension_numbers = #tpu.dot_dimension_numbers<[1], [0], [0], [1], [0, 0, 1, 1], [], []>} : vector<32x16xf32>, vector<16x288xf32>, vector<32x288xf32> -> vector<32x288xf32>
    %307 = arith.addf %303, %306 : vector<32x288xf32>
    %c0_183 = arith.constant 0 : index
    %c18_184 = arith.constant 18 : index
    %308 = vector.load %arg11[%c0_183, %c18_184] : memref<16x342xf32, #tpu.memory_space<vmem>>, vector<16x288xf32>
    %c96 = arith.constant 96 : index
    %c0_185 = arith.constant 0 : index
    %309 = vector.load %arg7[%c96, %c0_185] : memref<288x16xf32, #tpu.memory_space<vmem>>, vector<32x16xf32>
    %cst_186 = arith.constant dense<0.000000e+00> : vector<32x288xf32>
    %310 = tpu.matmul %309, %308, %cst_186 {dimension_numbers = #tpu.dot_dimension_numbers<[1], [0], [0], [1], [0, 0, 1, 1], [], []>} : vector<32x16xf32>, vector<16x288xf32>, vector<32x288xf32> -> vector<32x288xf32>
    %311 = arith.addf %307, %310 : vector<32x288xf32>
    %c0_187 = arith.constant 0 : index
    %c19_188 = arith.constant 19 : index
    %312 = vector.load %arg11[%c0_187, %c19_188] : memref<16x342xf32, #tpu.memory_space<vmem>>, vector<16x288xf32>
    %c128 = arith.constant 128 : index
    %c0_189 = arith.constant 0 : index
    %313 = vector.load %arg7[%c128, %c0_189] : memref<288x16xf32, #tpu.memory_space<vmem>>, vector<32x16xf32>
    %cst_190 = arith.constant dense<0.000000e+00> : vector<32x288xf32>
    %314 = tpu.matmul %313, %312, %cst_190 {dimension_numbers = #tpu.dot_dimension_numbers<[1], [0], [0], [1], [0, 0, 1, 1], [], []>} : vector<32x16xf32>, vector<16x288xf32>, vector<32x288xf32> -> vector<32x288xf32>
    %315 = arith.addf %311, %314 : vector<32x288xf32>
    %c0_191 = arith.constant 0 : index
    %c20_192 = arith.constant 20 : index
    %316 = vector.load %arg11[%c0_191, %c20_192] : memref<16x342xf32, #tpu.memory_space<vmem>>, vector<16x288xf32>
    %c160 = arith.constant 160 : index
    %c0_193 = arith.constant 0 : index
    %317 = vector.load %arg7[%c160, %c0_193] : memref<288x16xf32, #tpu.memory_space<vmem>>, vector<32x16xf32>
    %cst_194 = arith.constant dense<0.000000e+00> : vector<32x288xf32>
    %318 = tpu.matmul %317, %316, %cst_194 {dimension_numbers = #tpu.dot_dimension_numbers<[1], [0], [0], [1], [0, 0, 1, 1], [], []>} : vector<32x16xf32>, vector<16x288xf32>, vector<32x288xf32> -> vector<32x288xf32>
    %319 = arith.addf %315, %318 : vector<32x288xf32>
    %c0_195 = arith.constant 0 : index
    %c36_196 = arith.constant 36 : index
    %320 = vector.load %arg11[%c0_195, %c36_196] : memref<16x342xf32, #tpu.memory_space<vmem>>, vector<16x288xf32>
    %c192 = arith.constant 192 : index
    %c0_197 = arith.constant 0 : index
    %321 = vector.load %arg7[%c192, %c0_197] : memref<288x16xf32, #tpu.memory_space<vmem>>, vector<32x16xf32>
    %cst_198 = arith.constant dense<0.000000e+00> : vector<32x288xf32>
    %322 = tpu.matmul %321, %320, %cst_198 {dimension_numbers = #tpu.dot_dimension_numbers<[1], [0], [0], [1], [0, 0, 1, 1], [], []>} : vector<32x16xf32>, vector<16x288xf32>, vector<32x288xf32> -> vector<32x288xf32>
    %323 = arith.addf %319, %322 : vector<32x288xf32>
    %c0_199 = arith.constant 0 : index
    %c37_200 = arith.constant 37 : index
    %324 = vector.load %arg11[%c0_199, %c37_200] : memref<16x342xf32, #tpu.memory_space<vmem>>, vector<16x288xf32>
    %c224 = arith.constant 224 : index
    %c0_201 = arith.constant 0 : index
    %325 = vector.load %arg7[%c224, %c0_201] : memref<288x16xf32, #tpu.memory_space<vmem>>, vector<32x16xf32>
    %cst_202 = arith.constant dense<0.000000e+00> : vector<32x288xf32>
    %326 = tpu.matmul %325, %324, %cst_202 {dimension_numbers = #tpu.dot_dimension_numbers<[1], [0], [0], [1], [0, 0, 1, 1], [], []>} : vector<32x16xf32>, vector<16x288xf32>, vector<32x288xf32> -> vector<32x288xf32>
    %327 = arith.addf %323, %326 : vector<32x288xf32>
    %c0_203 = arith.constant 0 : index
    %c38_204 = arith.constant 38 : index
    %328 = vector.load %arg11[%c0_203, %c38_204] : memref<16x342xf32, #tpu.memory_space<vmem>>, vector<16x288xf32>
    %c256 = arith.constant 256 : index
    %c0_205 = arith.constant 0 : index
    %329 = vector.load %arg7[%c256, %c0_205] : memref<288x16xf32, #tpu.memory_space<vmem>>, vector<32x16xf32>
    %cst_206 = arith.constant dense<0.000000e+00> : vector<32x288xf32>
    %330 = tpu.matmul %329, %328, %cst_206 {dimension_numbers = #tpu.dot_dimension_numbers<[1], [0], [0], [1], [0, 0, 1, 1], [], []>} : vector<32x16xf32>, vector<16x288xf32>, vector<32x288xf32> -> vector<32x288xf32>
    %331 = arith.addf %327, %330 : vector<32x288xf32>
    %c0_207 = arith.constant 0 : index
    %c0_208 = arith.constant 0 : index
    %332 = vector.load %arg8[%c0_207, %c0_208] : memref<32x1xf32, #tpu.memory_space<vmem>>, vector<32x1xf32>
    %333 = vector.broadcast %332 : vector<32x1xf32> to vector<32x288xf32>
    %334 = arith.addf %331, %333 : vector<32x288xf32>
    %cst_209 = arith.constant 0.000000e+00 : f32
    %335 = vector.broadcast %cst_209 : f32 to vector<32x288xf32>
    %336 = arith.maximumf %334, %335 : vector<32x288xf32>
    %337 = arith.addf %217, %290 : vector<8x288xf32>
    %c0_210 = arith.constant 0 : index
    %c0_211 = arith.constant 0 : index
    %c0_212 = arith.constant 0 : index
    %338 = vector.load %arg9[%c0_210, %c0_211, %c0_212] : memref<1x8x288xf32, #tpu.memory_space<vmem>>, vector<1x8x288xf32>
    %339 = vector.shape_cast %338 : vector<1x8x288xf32> to vector<8x288xf32>
    %340 = vector.shape_cast %337 : vector<8x288xf32> to vector<1x8x288xf32>
    tpu.vector_store %arg9[%c0_210, %c0_211, %c0_212], %340 {strides = array<i32>} : memref<1x8x288xf32, #tpu.memory_space<vmem>>, vector<1x8x288xf32>,
    %341 = vector.extract_strided_slice %336 {offsets = [0, 0], sizes = [16, 288], strides = [1, 1]} : vector<32x288xf32> to vector<16x288xf32>
    %342 = vector.extract_strided_slice %336 {offsets = [16, 0], sizes = [16, 288], strides = [1, 1]} : vector<32x288xf32> to vector<16x288xf32>
    %343 = arith.addf %341, %342 : vector<16x288xf32>
    %c0_213 = arith.constant 0 : index
    %c0_214 = arith.constant 0 : index
    %c0_215 = arith.constant 0 : index
    %344 = vector.load %arg10[%c0_213, %c0_214, %c0_215] : memref<1x16x288xf32, #tpu.memory_space<vmem>>, vector<1x16x288xf32>
    %345 = vector.shape_cast %344 : vector<1x16x288xf32> to vector<16x288xf32>
    %346 = vector.shape_cast %343 : vector<16x288xf32> to vector<1x16x288xf32>
    tpu.vector_store %arg10[%c0_213, %c0_214, %c0_215], %346 {strides = array<i32>} : memref<1x16x288xf32, #tpu.memory_space<vmem>>, vector<1x16x288xf32>,
    return
  }
  func.func @transform_0(%arg0: i32) -> (i32, i32, i32) {
    %c0_i32 = arith.constant 0 : i32
    %c0_i32_0 = arith.constant 0 : i32
    %c0_i32_1 = arith.constant 0 : i32
    return %arg0, %c0_i32, %c0_i32_0 : i32, i32, i32
  }
  func.func @transform_1(%arg0: i32) -> (i32, i32, i32) {
    %c0_i32 = arith.constant 0 : i32
    %c0_i32_0 = arith.constant 0 : i32
    %c0_i32_1 = arith.constant 0 : i32
    return %arg0, %c0_i32, %c0_i32_0 : i32, i32, i32
  }
  func.func @transform_2(%arg0: i32) -> (i32, i32) {
    %c0_i32 = arith.constant 0 : i32
    %c0_i32_0 = arith.constant 0 : i32
    %c0_i32_1 = arith.constant 0 : i32
    return %c0_i32, %c0_i32_0 : i32, i32
  }
  func.func @transform_3(%arg0: i32) -> (i32, i32) {
    %c0_i32 = arith.constant 0 : i32
    %c0_i32_0 = arith.constant 0 : i32
    %c0_i32_1 = arith.constant 0 : i32
    return %c0_i32, %c0_i32_0 : i32, i32
  }
  func.func @transform_4(%arg0: i32) -> (i32, i32) {
    %c0_i32 = arith.constant 0 : i32
    %c0_i32_0 = arith.constant 0 : i32
    %c0_i32_1 = arith.constant 0 : i32
    return %c0_i32, %c0_i32_0 : i32, i32
  }
  func.func @transform_5(%arg0: i32) -> (i32, i32) {
    %c0_i32 = arith.constant 0 : i32
    %c0_i32_0 = arith.constant 0 : i32
    %c0_i32_1 = arith.constant 0 : i32
    return %c0_i32, %c0_i32_0 : i32, i32
  }
  func.func @transform_6(%arg0: i32) -> (i32, i32) {
    %c0_i32 = arith.constant 0 : i32
    %c0_i32_0 = arith.constant 0 : i32
    %c0_i32_1 = arith.constant 0 : i32
    return %c0_i32, %c0_i32_0 : i32, i32
  }
  func.func @transform_7(%arg0: i32) -> (i32, i32) {
    %c0_i32 = arith.constant 0 : i32
    %c0_i32_0 = arith.constant 0 : i32
    %c0_i32_1 = arith.constant 0 : i32
    return %c0_i32, %c0_i32_0 : i32, i32
  }
  func.func @transform_8(%arg0: i32) -> (i32, i32, i32) {
    %c0_i32 = arith.constant 0 : i32
    %c0_i32_0 = arith.constant 0 : i32
    %c0_i32_1 = arith.constant 0 : i32
    return %arg0, %c0_i32, %c0_i32_0 : i32, i32, i32
  }
  func.func @transform_9(%arg0: i32) -> (i32, i32, i32) {
    %c0_i32 = arith.constant 0 : i32
    %c0_i32_0 = arith.constant 0 : i32
    %c0_i32_1 = arith.constant 0 : i32
    return %arg0, %c0_i32, %c0_i32_0 : i32, i32, i32
  }
}

</mosaic_0001>

<bundles_post_ra>
// kernel: _fused_forward.1
= control target key start
LH: loop header
LB: loop body
LE: loop exit
PB: predicated region body
PF: predicated region fallthrough
CT: control target
= control target key end

     0   :  { %s4241_s30 = smov 0   ;;  %s5542_s0 = inlined_call_operand.vmem [shape: f32[2,3,342], index: 0, kind: input, shape index: {}]   ;;  %s5543_s1 = inlined_call_operand.vmem [shape: f32[2,1,342], index: 1, kind: input, shape index: {}]   ;;  %s5544_s2 = inlined_call_operand.vmem [shape: f32[8,27], index: 2, kind: input, shape index: {}]   ;;  %s5545_s3 = inlined_call_operand.vmem [shape: f32[8,1], index: 3, kind: input, shape index: {}]   ;;  %s5546_s4 = inlined_call_operand.vmem [shape: f32[8,9], index: 4, kind: input, shape index: {}]   ;;  %s5547_s5 = inlined_call_operand.vmem [shape: f32[8,1], index: 5, kind: input, shape index: {}]   ;;  %s5548_s6 = inlined_call_operand.vmem [shape: f32[288,16], index: 6, kind: input, shape index: {}]   ;;  %s5549_s7 = inlined_call_operand.vmem [shape: f32[32,1], index: 7, kind: input, shape index: {}]   ;;  %s5550_s8 = inlined_call_operand.vmem [shape: f32[2,8,288], index: 8, kind: output, shape index: {0}]   ;;  %s5551_s9 = inlined_call_operand.vmem [shape: f32[2,16,288], index: 9, kind: output, shape index: {1}]  }
   0x1 LB: > { %s3538_s10 = sadd.s32 4294967295, %s4152_s30   ;;  %p3542_p0 = scmp.ge.s32.totalorder %s4152_s30, 1  ;;  %s4152_s30 = sphi %s4241_s30, %s20_s30  }
   0x2   : > { %p299_p1 = scmp.lt.s32.totalorder %s4152_s30, 3 }
   0x4   : > { %p300_p2 = pnand %p3542_p0, %p299_p1 }
   0x5   : > { %v4252_v0 = vld [vmem:[%s5544_s2] sm:$0xff] (!%p300_p2)  ;;  %v4154_v1 = vmov (!%p300_p2), 3   ;;  %v4155_v2 = vmov (!%p300_p2), 5   ;;  %v4156_v3 = vmov (!%p300_p2), 8   ;;  %v4157_v4 = vmov (!%p300_p2), 6   ;;  %p344_p3 = scmp.lt.s32.totalorder (!%p300_p2), %s3538_s10, 1 }
   0x6   : > { %303 = sbr.rel (%p300_p2) target bundleno = 1085 (0x43d), region = 52  ;;  %3991 = vset.pattern.permute.xlu0 (!%p300_p2), %v4154_v1  ;;  %3992 = vset.pattern.permute.xlu1 (!%p300_p2), %v4155_v2  ;;  %v4158_v5 = vmov (!%p300_p2), 11   ;;  %v4159_v6 = vmov (!%p300_p2), 7   ;;  %v4160_v7 = vmov (!%p300_p2), 14   ;;  %v4161_v8 = vmov (!%p300_p2), 9   ;;  %v4271_v11 = vld [vmem:[%s5546_s4] sm:$0xff] (!%p300_p2) }
   0x7   : > { %504 = vperm.xlu0 (!%p300_p2), %3991, %v4252_v0   ;;  %553 = vperm.xlu1 (!%p300_p2), %3992, %v4252_v0   ;;  %v4162_v9 = vmov (!%p300_p2), 17   ;;  %v4163_v10 = vmov (!%p300_p2), 10   ;;  %v4164_v12 = vmov (!%p300_p2), 1   ;;  %v4165_v13 = vmov (!%p300_p2), 12   ;;  %s4181_s19 = smov (!%p300_p2), 127   ;;  %s4182_s20 = smov (!%p300_p2), 126  }
   0x8   : > { %v4166_v14 = vmov (!%p300_p2), 21   ;;  %v4167_v15 = vmov (!%p300_p2), 13   ;;  %v4168_v16 = vmov (!%p300_p2), 4   ;;  %v4169_v17 = vmov (!%p300_p2), 15   ;;  %s4183_s21 = smov (!%p300_p2), 110   ;;  %s4184_s22 = smov (!%p300_p2), 109  }
   0x9   : > { %v4170_v18 = vmov (!%p300_p2), 16   ;;  %v4171_v19 = vmov (!%p300_p2), 24   ;;  %v4172_v20 = vmov (!%p300_p2), 18   ;;  %v4173_v21 = vmov (!%p300_p2), 19   ;;  %s4185_s23 = smov (!%p300_p2), 108   ;;  %s4186_s28 = smov (!%p300_p2), 92  }
   0xa   : > { %v4174_v22 = vmov (!%p300_p2), 0   ;;  %v4175_v23 = vmov (!%p300_p2), 20   ;;  %v4176_v24 = vmov (!%p300_p2), 2   ;;  %v4177_v25 = vmov (!%p300_p2), 22   ;;  %s4187_s29 = smov (!%p300_p2), 91   ;;  %s4188_s11 = smov (!%p300_p2), 90  }
   0xb   : > { %3995 = vset.pattern.permute.xlu0 (!%p300_p2), %v4156_v3  ;;  %3993 = vset.pattern.permute.xlu1 (!%p300_p2), %v4157_v4  ;;  %v4178_v26 = vmov (!%p300_p2), 23   ;;  %v4179_v27 = vmov (!%p300_p2), 25   ;;  %v4180_v28 = vmov (!%p300_p2), 26   ;;  %v363_v29 = vlaneseq (!%p300_p2)  ;;  %s4190_s17 = smov (!%p300_p2), 19  }
   0xc   : > { %626 = vperm.xlu0 (!%p300_p2), %3995, %v4252_v0   ;;  %577 = vperm.xlu1 (!%p300_p2), %3993, %v4252_v0   ;;  %vm519_vm0 = vcmask (!%p300_p2), 1039360   ;;  %vm592_vm1 = vcmask (!%p300_p2), 1031168   ;;  %vm665_vm2 = vcmask (!%p300_p2), 900096   ;;  %vm738_vm3 = vcmask (!%p300_p2), 891904  }
   0xd   : > { %s5561_s10 = smov (!%p344_p3, %s3538_s10), 1  ;;  %v427_v30 = vshrl.u32 %v363_v29, 7  ;;  %vm811_vm4 = vcmask 883712   ;;  %vm884_vm5 = vcmask 752640   ;;  %vm957_vm6 = vcmask 744448  }
   0xe   : > { %s3936_s15 = smul.u32 12, %s5561_s10  ;;  %vm1030_vm13 = vcmask 736256  }
   0xf   : > { %v4313_v31 = vsub.s32 1, %v427_v30  ;;  %v4315_v32 = vsub.s32 0, %v427_v30  ;;  %v4323_v36 = vsub.s32 2, %v427_v30  ;;  %s3937_s24 = smul.u32 3, %s5561_s10 }
  0x10   : > { %3998 = vset.pattern.permute.xlu0 %v4158_v5  ;;  %3994 = vset.pattern.permute.xlu1 %v4159_v6  ;;  %s348_s18 = scalar_lea.vmem %s5542_s0, %s3936_s15  ;;  %s3938_s16 = smul.u32 24, %s5561_s10 }
  0x11   : > { %699 = vperm.xlu0 %3998, %v4252_v0   ;;  %602 = vperm.xlu1 %3994, %v4252_v0   ;;  %v418_v33 = vld [vmem:[%s348_s18] ss:$4 sm:$0x7]  ;;  %v3546_v51 = vld [vmem:[%s348_s18 + $0x1] ss:$4 sm:$0x7]  ;;  %s352_s27 = scalar_lea.vmem %s5543_s1, %s3937_s24 }
  0x12   : > { %v4318_v34 = vrot.slane %v418_v33, %v4313_v31  ;;  %v4321_v35 = vrot.slane %v418_v33, %v4315_v32  ;;  %v4328_v40 = vrot.slane %v418_v33, %v4323_v36  ;;  %v4345_v53 = vrot.slane %v3546_v51, %v4315_v32  ;;  %v3547_v55 = vld [vmem:[%s348_s18 + $0x2] ss:$4 sm:$0x7]  ;;  %s357_s25 = scalar_lea.vmem %s5550_s8, %s3938_s16 }
  0x13   : > { %v4348_v54 = vrot.slane %v3546_v51, %v4313_v31  ;;  %v4353_v60 = vrot.slane %v3546_v51, %v4323_v36  ;;  %v4356_v61 = vrot.slane %v3547_v55, %v4315_v32 }
  0x15   : > { %4001 = vset.pattern.permute.xlu0 %v4160_v7  ;;  %3996 = vset.pattern.permute.xlu1 %v4161_v8 }
  0x16   : > { %772 = vperm.xlu0 %4001, %v4252_v0   ;;  %650 = vperm.xlu1 %3996, %v4252_v0  }
  0x1a   : > { %4004 = vset.pattern.permute.xlu0 %v4162_v9  ;;  %3997 = vset.pattern.permute.xlu1 %v4163_v10 }
  0x1b   : > { %845 = vperm.xlu0 %4004, %v4252_v0   ;;  %675 = vperm.xlu1 %3997, %v4252_v0  }
  0x1f   : > { %4007 = vset.pattern.permute.xlu0 %v4164_v12  ;;  %3999 = vset.pattern.permute.xlu1 %v4165_v13 }
  0x20   : > { %1138 = vperm.xlu0 %4007, %v4271_v11   ;;  %723 = vperm.xlu1 %3999, %v4252_v0  }
  0x24   : > { %4010 = vset.pattern.permute.xlu0 %v4166_v14  ;;  %4000 = vset.pattern.permute.xlu1 %v4167_v15 }
  0x25   : > { %942 = vperm.xlu0 %4010, %v4252_v0   ;;  %748 = vperm.xlu1 %4000, %v4252_v0  }
  0x29   : > { %4011 = vset.pattern.permute.xlu0 %v4168_v16  ;;  %4002 = vset.pattern.permute.xlu1 %v4169_v17 }
  0x2a   : > { %529 = vperm.xlu0 %4011, %v4252_v0   ;;  %796 = vperm.xlu1 %4002, %v4252_v0  }
  0x2e   : > { %1210 = vperm.xlu0 %4011, %v4271_v11   ;;  %4003 = vset.pattern.permute.xlu1 %v4170_v18 }
  0x2f   : > { %821 = vperm.xlu1 %4003, %v4252_v0  }
  0x32   : > { %4016 = vset.pattern.permute.xlu0 %v4171_v19 }
  0x33   : > { %4005 = vset.pattern.permute.xlu1 %v4172_v20  ;;  %1015 = vperm.xlu0 %4016, %v4252_v0  }
  0x34   : > { %869 = vperm.xlu1 %4005, %v4252_v0  }
  0x37   : > { %4019 = vset.pattern.permute.xlu0 %v4159_v6 }
  0x38   : > { %4006 = vset.pattern.permute.xlu1 %v4173_v21  ;;  %1282 = vperm.xlu0 %4019, %v4271_v11  }
  0x39   : > { %894 = vperm.xlu1 %4006, %v4252_v0  }
  0x3c   : > { %4022 = vset.pattern.permute.xlu0 %v4174_v22 }
  0x3d   : > { %4008 = vset.pattern.permute.xlu1 %v4175_v23  ;;  %422 = vperm.xlu0 %4022, %v4252_v0  }
  0x3e   : > { %918 = vperm.xlu1 %4008, %v4252_v0  }
  0x42   : > { %4009 = vset.pattern.permute.xlu1 %v4176_v24 }
  0x43   : > { %1162 = vperm.xlu1 %4009, %v4271_v11  }
  0x47   : > { %4012 = vset.pattern.permute.xlu1 %v4154_v1  ;;  %v4363_v1 = vrot.slane %v3547_v55, %v4313_v31 }
  0x48   : > { %1186 = vperm.xlu1 %4012, %v4271_v11  }
  0x4c   : > { %4013 = vset.pattern.permute.xlu1 %v4177_v25 }
  0x4d   : > { %967 = vperm.xlu1 %4013, %v4252_v0  }
  0x51   : > { %4014 = vset.pattern.permute.xlu1 %v4178_v26 }
  0x52   : > { %991 = vperm.xlu1 %4014, %v4252_v0  }
  0x56   : > { %4015 = vset.pattern.permute.xlu1 %v4155_v2  ;;  %v4366_v2 = vrot.slane %v3547_v55, %v4323_v36 }
  0x57   : > { %1234 = vperm.xlu1 %4015, %v4271_v11  }
  0x5b   : > { %4017 = vset.pattern.permute.xlu1 %v4157_v4 }
  0x5c   : > { %1258 = vperm.xlu1 %4017, %v4271_v11  }
  0x60   : > { %4018 = vset.pattern.permute.xlu1 %v4179_v27 }
  0x61   : > { %1040 = vperm.xlu1 %4018, %v4252_v0  }
  0x65   : > { %4020 = vset.pattern.permute.xlu1 %v4180_v28 }
  0x66   : > { %1064 = vperm.xlu1 %4020, %v4252_v0  }
  0x6a   : > { %4021 = vset.pattern.permute.xlu1 %v4156_v3 }
  0x6b   : > { %1306 = vperm.xlu1 %4021, %v4271_v11  }
  0x6f   : > { %4023 = vset.pattern.permute.xlu1 %v4164_v12 }
  0x70   : > { %450 = vperm.xlu1 %4023, %v4252_v0  }
  0x74   : > { %4024 = vset.pattern.permute.xlu1 %v4176_v24 }
  0x75   : > { %478 = vperm.xlu1 %4024, %v4252_v0  }
  0x79   : > { %4025 = vset.pattern.permute.xlu1 %v4174_v22 }
  0x86   : > { %v505_v37 = vpop.permute.xlu0 %504  ;;  %v554_v44 = vpop.permute.xlu1 %553 }
  0x87   : > { %v508_v38 = vmul.f32 %v505_v37, %v4318_v34  ;;  %v507_v39 = vmul.f32 %v505_v37, %v4321_v35  ;;  %v509_v42 = vmul.f32 %v505_v37, %v4328_v40  ;;  %v556_v62 = vmul.f32 %v554_v44, %v4356_v61 }
  0x88   : > { %v557_v3 = vmul.f32 %v554_v44, %v4363_v1  ;;  %v558_v4 = vmul.f32 %v554_v44, %v4366_v2 }
  0x89   : > { %515 = vrot.lane.b32.xlu1 %v508_v38, %s4181_s19  ;;  %513 = vrot.lane.b32.xlu0 %v507_v39, %s4181_s19 }
  0x8b   : > { %v627_v41 = vpop.permute.xlu0 %626  ;;  %v578_v46 = vpop.permute.xlu1 %577 }
  0x8c   : > { %v580_v6 = vmul.f32 %v578_v46, %v4321_v35  ;;  %v581_v7 = vmul.f32 %v578_v46, %v4318_v34  ;;  %v582_v10 = vmul.f32 %v578_v46, %v4328_v40  ;;  %v629_v15 = vmul.f32 %v627_v41, %v4356_v61 }
  0x8d   : > { %517 = vrot.lane.b32.xlu0 %v509_v42, %s4181_s19  ;;  %v630_v16 = vmul.f32 %v627_v41, %v4363_v1  ;;  %v631_v19 = vmul.f32 %v627_v41, %v4366_v2 }
  0x90   : > { %v4334_v43 = vpop.permute.xlu0 %699  ;;  %v603_v48 = vpop.permute.xlu1 %602 }
  0x91   : > { %v605_v8 = vmul.f32 %v603_v48, %v4345_v53  ;;  %v606_v12 = vmul.f32 %v603_v48, %v4348_v54  ;;  %v607_v13 = vmul.f32 %v603_v48, %v4353_v60  ;;  %v702_v27 = vmul.f32 %v4334_v43, %v4356_v61 }
  0x92   : > { %v703_v28 = vmul.f32 %v4334_v43, %v4363_v1  ;;  %v704_v30 = vmul.f32 %v4334_v43, %v4366_v2 }
  0x95   : > { %v4336_v45 = vpop.permute.xlu0 %772  ;;  %v651_v50 = vpop.permute.xlu1 %650 }
  0x96   : > { %v653_v17 = vmul.f32 %v651_v50, %v4321_v35  ;;  %v654_v20 = vmul.f32 %v651_v50, %v4318_v34  ;;  %v655_v21 = vmul.f32 %v651_v50, %v4328_v40  ;;  %v775_v48 = vmul.f32 %v4336_v45, %v4356_v61 }
  0x97   : > { %v776_v50 = vmul.f32 %v4336_v45, %v4363_v1  ;;  %v777_v55 = vmul.f32 %v4336_v45, %v4366_v2 }
  0x9a   : > { %v4338_v47 = vpop.permute.xlu0 %845  ;;  %v676_v56 = vpop.permute.xlu1 %675 }
  0x9b   : > { %v678_v23 = vmul.f32 %v676_v56, %v4345_v53  ;;  %v679_v24 = vmul.f32 %v676_v56, %v4348_v54  ;;  %v680_v26 = vmul.f32 %v676_v56, %v4353_v60 }
  0x9f   : > { %v4340_v49 = vpop.permute.xlu0 %1138  ;;  %v724_v0 = vpop.permute.xlu1 %723 }
  0xa0   : > { %v726_v37 = vmul.f32 %v724_v0, %v4321_v35  ;;  %v727_v38 = vmul.f32 %v724_v0, %v4318_v34  ;;  %v728_v41 = vmul.f32 %v724_v0, %v4328_v40 }
  0xa4   : > { %v4342_v52 = vpop.permute.xlu0 %942  ;;  %v749_v5 = vpop.permute.xlu1 %748 }
  0xa5   : > { %v751_v42 = vmul.f32 %v749_v5, %v4345_v53  ;;  %v752_v43 = vmul.f32 %v749_v5, %v4348_v54  ;;  %v753_v44 = vmul.f32 %v749_v5, %v4353_v60 }
  0xa9   : > { %v530_v57 = vpop.permute.xlu0 %529  ;;  %v4379_v9 = vpop.permute.xlu1 %796 }
  0xaa   : > { %v532_v58 = vmul.f32 %v530_v57, %v4345_v53  ;;  %v533_v59 = vmul.f32 %v530_v57, %v4348_v54  ;;  %v534_v63 = vmul.f32 %v530_v57, %v4353_v60  ;;  %v799_v56 = vmul.f32 %v4379_v9, %v4321_v35 }
  0xab   : > { %v800_v57 = vmul.f32 %v4379_v9, %v4318_v34 }
  0xac   : > { %538 = vrot.lane.b32.xlu1 %v532_v58, %s4181_s19  ;;  %540 = vrot.lane.b32.xlu0 %v533_v59, %s4181_s19  ;;  %v801_v58 = vmul.f32 %v4379_v9, %v4328_v40 }
  0xad   : > { %v4484_v5 = vpop.permute.xlu0 %1210 }
  0xae   : > { %v4386_v14 = vpop.permute.xlu1 %821 }
  0xaf   : > { %v824_v45 = vmul.f32 %v4386_v14, %v4345_v53  ;;  %v826_v0 = vmul.f32 %v4386_v14, %v4353_v60 }
  0xb0   : > { %542 = vrot.lane.b32.xlu1 %v534_v63, %s4181_s19  ;;  %562 = vrot.lane.b32.xlu0 %v556_v62, %s4181_s19  ;;  %v825_v63 = vmul.f32 %v4386_v14, %v4348_v54 }
  0xb2   : > { %v4497_v9 = vpop.permute.xlu0 %1015 }
  0xb3   : > { %v4395_v18 = vpop.permute.xlu1 %869 }
  0xb4   : > { %564 = vrot.lane.b32.xlu1 %v557_v3, %s4181_s19  ;;  %566 = vrot.lane.b32.xlu0 %v558_v4, %s4181_s19  ;;  %v848_v3 = vmul.f32 %v4338_v47, %v4356_v61 }
  0xb8   : > { %586 = vrot.lane.b32.xlu1 %v580_v6, %s4182_s20  ;;  %588 = vrot.lane.b32.xlu0 %v581_v7, %s4182_s20  ;;  %v4402_v22 = vpop.permute.xlu1 %894  ;;  %v850_v6 = vmul.f32 %v4338_v47, %v4366_v2  ;;  %v872_v7 = vmul.f32 %v4395_v18, %v4321_v35 }
  0xb9   : > { %v897_v14 = vmul.f32 %v4402_v22, %v4345_v53 }
  0xbc   : > { %590 = vrot.lane.b32.xlu1 %v582_v10, %s4182_s20  ;;  %611 = vrot.lane.b32.xlu0 %v605_v8, %s4182_s20  ;;  %v873_v10 = vmul.f32 %v4395_v18, %v4318_v34 }
  0xbd   : > { %v4410_v25 = vpop.permute.xlu1 %918 }
  0xc0   : > { %613 = vrot.lane.b32.xlu1 %v606_v12, %s4182_s20  ;;  %615 = vrot.lane.b32.xlu0 %v607_v13, %s4182_s20  ;;  %v1108_v12 = vld [vmem:[%s352_s27] sm:$0x7] }
  0xc1   : > { %v4506_v13 = vrot.slane %v1108_v12, %v4315_v32  ;;  %v4522_v32 = vrot.slane %v1108_v12, %v4323_v36 }
  0xc2   : > { %v4421_v33 = vpop.permute.xlu1 %1162 }
  0xc3   : > { %v1143_v36 = vmul.f32 %v4340_v49, %v4522_v32 }
  0xc4   : > { %635 = vrot.lane.b32.xlu1 %v629_v15, %s4182_s20  ;;  %637 = vrot.lane.b32.xlu0 %v630_v16, %s4182_s20  ;;  %v898_v15 = vmul.f32 %v4402_v22, %v4348_v54 }
  0xc7   : > { %v4429_v39 = vpop.permute.xlu1 %1186 }
  0xc8   : > { %639 = vrot.lane.b32.xlu1 %v631_v19, %s4182_s20  ;;  %659 = vrot.lane.b32.xlu0 %v653_v17, %s4183_s21  ;;  %v4514_v17 = vpop.permute.xlu0 %1282  ;;  %v899_v19 = vmul.f32 %v4402_v22, %v4353_v60  ;;  %v921_v22 = vmul.f32 %v4410_v25, %v4356_v61 }
  0xcc   : > { %661 = vrot.lane.b32.xlu1 %v654_v20, %s4183_s21  ;;  %663 = vrot.lane.b32.xlu0 %v655_v21, %s4183_s21  ;;  %v4437_v46 = vpop.permute.xlu1 %967  ;;  %v1141_v20 = vmul.f32 %v4340_v49, %v4506_v13 }
  0xd0   : > { %684 = vrot.lane.b32.xlu1 %v678_v23, %s4183_s21  ;;  %686 = vrot.lane.b32.xlu0 %v679_v24, %s4183_s21  ;;  %v922_v24 = vmul.f32 %v4410_v25, %v4363_v1 }
  0xd1   : > { %v4447_v51 = vpop.permute.xlu1 %991 }
  0xd4   : > { %688 = vrot.lane.b32.xlu1 %v680_v26, %s4183_s21  ;;  %708 = vrot.lane.b32.xlu0 %v702_v27, %s4183_s21 }
  0xd6   : > { %v4459_v59 = vpop.permute.xlu1 %1234 }
  0xd8   : > { %710 = vrot.lane.b32.xlu1 %v703_v28, %s4183_s21  ;;  %712 = vrot.lane.b32.xlu0 %v704_v30, %s4183_s21  ;;  %v1165_v28 = vmul.f32 %v4421_v33, %v4506_v13 }
  0xdb   : > { %v4467_v62 = vpop.permute.xlu1 %1258 }
  0xdc   : > { %732 = vrot.lane.b32.xlu1 %v726_v37, %s4184_s22  ;;  %734 = vrot.lane.b32.xlu0 %v727_v38, %s4184_s22 }
  0xe0   : > { %736 = vrot.lane.b32.xlu1 %v728_v41, %s4184_s22  ;;  %757 = vrot.lane.b32.xlu0 %v751_v42, %s4184_s22  ;;  %v4480_v4 = vpop.permute.xlu1 %1040  ;;  %v1167_v41 = vmul.f32 %v4421_v33, %v4522_v32 }
  0xe4   : > { %759 = vrot.lane.b32.xlu1 %v752_v43, %s4184_s22  ;;  %761 = vrot.lane.b32.xlu0 %v753_v44, %s4184_s22  ;;  %v946_v44 = vmul.f32 %v4342_v52, %v4318_v34 }
  0xe5   : > { %v4495_v8 = vpop.permute.xlu1 %1064 }
  0xe8   : > { %781 = vrot.lane.b32.xlu1 %v775_v48, %s4184_s22  ;;  %783 = vrot.lane.b32.xlu0 %v776_v50, %s4184_s22 }
  0xea   : > { %v4512_v16 = vpop.permute.xlu1 %1306 }
  0xec   : > { %785 = vrot.lane.b32.xlu1 %v777_v55, %s4184_s22  ;;  %805 = vrot.lane.b32.xlu0 %v799_v56, %s4185_s23  ;;  %v1189_v55 = vmul.f32 %v4429_v39, %v4506_v13 }
  0xef   : > { %v4532_v23 = vpop.permute.xlu1 %450 }
  0xf0   : > { %807 = vrot.lane.b32.xlu1 %v800_v57, %s4185_s23  ;;  %809 = vrot.lane.b32.xlu0 %v801_v58, %s4185_s23 }
  0xf4   : > { %1112 = vperm.xlu1 %4025, %v4271_v11   ;;  %830 = vrot.lane.b32.xlu0 %v824_v45, %s4185_s23  ;;  %v849_v11 = vmul.f32 %v4338_v47, %v4363_v1  ;;  %v874_v47 = vmul.f32 %v4395_v18, %v4328_v40  ;;  %v4519_v18 = vrot.slane %v1108_v12, %v4313_v31  ;;  %v4534_v31 = vpop.permute.xlu0 %422  ;;  %v4544_v26 = vpop.permute.xlu1 %478 }
  0xf5   : > { %v970_v45 = vmul.f32 %v4437_v46, %v4345_v53 }
  0xf6   : > { %v1142_v21 = vmul.f32 %v4340_v49, %v4519_v18  ;;  %v923_v49 = vmul.f32 %v4410_v25, %v4366_v2  ;;  %v1166_v30 = vmul.f32 %v4421_v33, %v4519_v18  ;;  %v945_v25 = vmul.f32 %v4342_v52, %v4321_v35 }
  0xf7   : > { %v947_v33 = vmul.f32 %v4342_v52, %v4328_v40  ;;  %v1190_v56 = vmul.f32 %v4429_v39, %v4519_v18  ;;  %v1191_v52 = vmul.f32 %v4429_v39, %v4522_v32  ;;  %v972_v39 = vmul.f32 %v4437_v46, %v4353_v60 }
  0xf8   : > { %832 = vrot.lane.b32.xlu1 %v825_v63, %s4185_s23  ;;  %834 = vrot.lane.b32.xlu0 %v826_v0, %s4185_s23 }
  0xfb   : > { %v4546_v27 = vpop.permute.xlu0 %513  ;;  %v4558_v37 = vpop.permute.xlu1 %515 }
  0xfc   : > { %854 = vrot.lane.b32.xlu1 %v848_v3, %s4185_s23  ;;  %856 = vrot.lane.b32.xlu0 %v849_v11, %s4185_s23  ;;  %v971_v3 = vmul.f32 %v4437_v46, %v4348_v54  ;;  %v1215_v46 = vmul.f32 %v4484_v5, %v4522_v32 }
  0xff   : > { %v4560_v38 = vpop.permute.xlu0 %517 }
 0x100   : > { %858 = vrot.lane.b32.xlu1 %v850_v6, %s4185_s23  ;;  %878 = vrot.lane.b32.xlu0 %v872_v7, %s4186_s28  ;;  %v1213_v7 = vmul.f32 %v4484_v5, %v4506_v13 }
 0x104   : > { %880 = vrot.lane.b32.xlu1 %v873_v10, %s4186_s28  ;;  %882 = vrot.lane.b32.xlu0 %v874_v47, %s4186_s28  ;;  %v1214_v10 = vmul.f32 %v4484_v5, %v4519_v18  ;;  %v996_v5 = vmul.f32 %v4447_v51, %v4366_v2 }
 0x108   : > { %903 = vrot.lane.b32.xlu1 %v897_v14, %s4186_s28  ;;  %905 = vrot.lane.b32.xlu0 %v898_v15, %s4186_s28  ;;  %v994_v14 = vmul.f32 %v4447_v51, %v4356_v61  ;;  %v995_v15 = vmul.f32 %v4447_v51, %v4363_v1  ;;  %v1238_v51 = vmul.f32 %v4459_v59, %v4519_v18 }
 0x10c   : > { %907 = vrot.lane.b32.xlu1 %v899_v19, %s4186_s28  ;;  %1147 = vrot.lane.b32.xlu0 %v1141_v20, %s4181_s19 }
 0x110   : > { %1149 = vrot.lane.b32.xlu1 %v1142_v21, %s4181_s19  ;;  %1151 = vrot.lane.b32.xlu0 %v1143_v36, %s4181_s19  ;;  %v1237_v21 = vmul.f32 %v4459_v59, %v4506_v13 }
 0x114   : > { %927 = vrot.lane.b32.xlu1 %v921_v22, %s4186_s28  ;;  %929 = vrot.lane.b32.xlu0 %v922_v24, %s4186_s28  ;;  %v471_v24 = vmul.f32 %v4353_v60, %v4532_v23 }
 0x118   : > { %931 = vrot.lane.b32.xlu1 %v923_v49, %s4186_s28  ;;  %1171 = vrot.lane.b32.xlu0 %v1165_v28, %s4182_s20  ;;  %v443_v49 = vmul.f32 %v4328_v40, %v4534_v31  ;;  %v1239_v28 = vmul.f32 %v4459_v59, %v4522_v32  ;;  %v499_v59 = vmul.f32 %v4366_v2, %v4544_v26 }
 0x11c   : > { %1173 = vrot.lane.b32.xlu1 %v1166_v30, %s4182_s20  ;;  %1175 = vrot.lane.b32.xlu0 %v1167_v41, %s4182_s20  ;;  %v470_v30 = vmul.f32 %v4348_v54, %v4532_v23  ;;  %v442_v41 = vmul.f32 %v4318_v34, %v4534_v31 }
 0x11e   : > { %v4568_v42 = vpop.permute.xlu1 %538  ;;  %v4570_v43 = vpop.permute.xlu0 %540 }
 0x120   : > { %951 = vrot.lane.b32.xlu1 %v945_v25, %s4187_s29  ;;  %953 = vrot.lane.b32.xlu0 %v946_v44, %s4187_s29 }
 0x122   : > { %v4578_v48 = vpop.permute.xlu1 %542  ;;  %v4580_v50 = vpop.permute.xlu0 %562 }
 0x124   : > { %955 = vrot.lane.b32.xlu1 %v947_v33, %s4187_s29  ;;  %1195 = vrot.lane.b32.xlu0 %v1189_v55, %s4183_s21  ;;  %v469_v33 = vmul.f32 %v4345_v53, %v4532_v23  ;;  %v441_v55 = vmul.f32 %v4321_v35, %v4534_v31  ;;  %v498_v23 = vmul.f32 %v4363_v1, %v4544_v26 }
 0x126   : > { %v4588_v57 = vpop.permute.xlu1 %564  ;;  %v4590_v58 = vpop.permute.xlu0 %566 }
 0x128   : > { %1197 = vrot.lane.b32.xlu1 %v1190_v56, %s4183_s21  ;;  %1199 = vrot.lane.b32.xlu0 %v1191_v52, %s4183_s21  ;;  %v474_v56 = vadd.f32 %v471_v24, %v443_v49  ;;  %v1018_v52 = vmul.f32 %v4497_v9, %v4321_v35  ;;  %v520_v24 = vsel %vm519_vm0, %v4546_v27, %v4558_v37 }
 0x129   : > { %v1261_v49 = vmul.f32 %v4467_v62, %v4506_v13 }
 0x12a   : > { %v4598_v63 = vpop.permute.xlu1 %586  ;;  %v4600_v0 = vpop.permute.xlu0 %588  ;;  %v502_v35 = vadd.f32 %v499_v59, %v474_v56  ;;  %v568_v59 = vsel %vm519_vm0, %v4580_v50, %v4588_v57 }
 0x12b   : > { %v593_v50 = vsel %vm592_vm1, %v4598_v63, %v4600_v0 }
 0x12c   : > { %976 = vrot.lane.b32.xlu1 %v970_v45, %s4187_s29  ;;  %978 = vrot.lane.b32.xlu0 %v971_v3, %s4187_s29  ;;  %v1019_v45 = vmul.f32 %v4497_v9, %v4318_v34  ;;  %v473_v3 = vadd.f32 %v470_v30, %v442_v41  ;;  %v1087_v34 = vld [vmem:[%s5545_s3] sm:$0xff] }
 0x12e   : > { %v4608_v11 = vpop.permute.xlu1 %590  ;;  %v4610_v6 = vpop.permute.xlu0 %611 }
 0x130   : > { %980 = vrot.lane.b32.xlu1 %v972_v39, %s4187_s29  ;;  %1219 = vrot.lane.b32.xlu0 %v1213_v7, %s4184_s22  ;;  %v497_v7 = vmul.f32 %v4356_v61, %v4544_v26  ;;  %v521_v26 = vsel %vm519_vm0, %v4558_v37, %v4560_v38  ;;  %v569_v37 = vsel %vm519_vm0, %v4588_v57, %v4590_v58 }
 0x132   : > { %v4618_v47 = vpop.permute.xlu1 %613  ;;  %v4620_v12 = vpop.permute.xlu0 %615 }
 0x134   : > { %1221 = vrot.lane.b32.xlu1 %v1214_v10, %s4184_s22  ;;  %1223 = vrot.lane.b32.xlu0 %v1215_v46, %s4184_s22  ;;  %v472_v10 = vadd.f32 %v469_v33, %v441_v55  ;;  %v1020_v46 = vmul.f32 %v4497_v9, %v4328_v40  ;;  %v527_v40 = vadd.f32 %v4560_v38, %v502_v35 }
 0x135   : > { %v545_v9 = vsel %vm519_vm0, %v4570_v43, %v4578_v48  ;;  %v544_v33 = vsel %vm519_vm0, %v4568_v42, %v4570_v43  ;;  %v594_v42 = vsel %vm592_vm1, %v4600_v0, %v4608_v11  ;;  %v1329_v43 = vld [vmem:[%s5547_s5] sm:$0xff]  ;;  %v1043_v0 = vmul.f32 %v4480_v4, %v4345_v53 }
 0x136   : > { %v4630_v19 = vpop.permute.xlu1 %635  ;;  %v4632_v20 = vpop.permute.xlu0 %637  ;;  %v551_v27 = vadd.f32 %v4578_v48, %v527_v40  ;;  %v1263_v48 = vmul.f32 %v4467_v62, %v4522_v32 }
 0x138   : > { %1000 = vrot.lane.b32.xlu1 %v994_v14, %s4187_s29  ;;  %1002 = vrot.lane.b32.xlu0 %v995_v15, %s4187_s29  ;;  %v501_v14 = vadd.f32 %v498_v23, %v473_v3  ;;  %v575_v56 = vadd.f32 %v4590_v58, %v551_v27  ;;  %v618_v58 = vsel %vm592_vm1, %v4618_v47, %v4620_v12 }
 0x13a   : > { %v4640_v36 = vpop.permute.xlu1 %639  ;;  %v4642_v22 = vpop.permute.xlu0 %659  ;;  %v600_v57 = vadd.f32 %v4608_v11, %v575_v56  ;;  %v1044_v11 = vmul.f32 %v4480_v4, %v4348_v54 }
 0x13b   : > { %v642_v63 = vsel %vm592_vm1, %v4632_v20, %v4640_v36 }
 0x13c   : > { %1004 = vrot.lane.b32.xlu1 %v996_v5, %s4187_s29  ;;  %1243 = vrot.lane.b32.xlu0 %v1237_v21, %s4185_s23  ;;  %v500_v21 = vadd.f32 %v497_v7, %v472_v10  ;;  %v624_v35 = vadd.f32 %v4620_v12, %v600_v57 }
 0x13e   : > { %v4658_v25 = vpop.permute.xlu1 %661  ;;  %v4660_v44 = vpop.permute.xlu0 %663  ;;  %v525_v38 = vadd.f32 %v520_v24, %v500_v21 }
 0x13f   : > { %v667_v12 = vsel %vm665_vm2, %v4658_v25, %v4660_v44  ;;  %v666_v53 = vsel %vm665_vm2, %v4642_v22, %v4658_v25 }
 0x140   : > { %1245 = vrot.lane.b32.xlu1 %v1238_v51, %s4185_s23  ;;  %1247 = vrot.lane.b32.xlu0 %v1239_v28, %s4185_s23  ;;  %v1262_v51 = vmul.f32 %v4467_v62, %v4519_v18  ;;  %v526_v28 = vadd.f32 %v521_v26, %v501_v14  ;;  %v617_v62 = vsel %vm592_vm1, %v4610_v6, %v4618_v47 }
 0x141   : > { %v641_v6 = vsel %vm592_vm1, %v4630_v19, %v4632_v20  ;;  %v648_v47 = vadd.f32 %v4640_v36, %v624_v35  ;;  %v1045_v20 = vmul.f32 %v4480_v4, %v4353_v60  ;;  %v1285_v36 = vmul.f32 %v4514_v17, %v4506_v13 }
 0x142   : > { %v4676_v39 = vpop.permute.xlu1 %684  ;;  %v4678_v31 = vpop.permute.xlu0 %686  ;;  %v550_v55 = vadd.f32 %v545_v9, %v526_v28 }
 0x143   : > { %v673_v54 = vadd.f32 %v4660_v44, %v648_v47  ;;  %v690_v22 = vsel %vm665_vm2, %v4676_v39, %v4678_v31  ;;  %v1286_v39 = vmul.f32 %v4514_v17, %v4519_v18 }
 0x144   : > { %1024 = vrot.lane.b32.xlu1 %v1018_v52, %s4188_s11  ;;  %1026 = vrot.lane.b32.xlu0 %v1019_v45, %s4188_s11  ;;  %v549_v52 = vadd.f32 %v544_v33, %v525_v38  ;;  %v574_v45 = vadd.f32 %v569_v37, %v550_v55 }
 0x146   : > { %v4689_v15 = vpop.permute.xlu1 %688  ;;  %v4691_v5 = vpop.permute.xlu0 %708  ;;  %v573_v7 = vadd.f32 %v568_v59, %v549_v52  ;;  %v599_v10 = vadd.f32 %v594_v42, %v574_v45 }
 0x147   : > { %v691_v19 = vsel %vm665_vm2, %v4678_v31, %v4689_v15  ;;  %v697_v25 = vadd.f32 %v4689_v15, %v673_v54  ;;  %v1287_v31 = vmul.f32 %v4514_v17, %v4522_v32  ;;  %v1067_v17 = vmul.f32 %v4495_v8, %v4356_v61 }
 0x148   : > { %1028 = vrot.lane.b32.xlu1 %v1020_v46, %s4188_s11  ;;  %1090 = vperm.xlu0 %4022, %v1087_v34   ;;  %v598_v34 = vadd.f32 %v593_v50, %v573_v7  ;;  %v623_v46 = vadd.f32 %v618_v58, %v599_v10  ;;  %v1069_v61 = vmul.f32 %v4495_v8, %v4366_v2 }
 0x149   : > { %v1310_v2 = vmul.f32 %v4512_v16, %v4519_v18 }
 0x14a   : > { %v711_v30 = vpop.permute.xlu1 %710  ;;  %v713_v41 = vpop.permute.xlu0 %712  ;;  %v622_v21 = vadd.f32 %v617_v62, %v598_v34  ;;  %v647_v24 = vadd.f32 %v642_v63, %v623_v46 }
 0x14b   : > { %v715_v44 = vsel %vm665_vm2, %v711_v30, %v713_v41  ;;  %v714_v60 = vsel %vm665_vm2, %v4691_v5, %v711_v30  ;;  %v721_v4 = vadd.f32 %v713_v41, %v697_v25 }
 0x14c   : > { %1267 = vrot.lane.b32.xlu1 %v1261_v49, %s4186_s28  ;;  %1269 = vrot.lane.b32.xlu0 %v1262_v51, %s4186_s28  ;;  %v646_v40 = vadd.f32 %v641_v6, %v622_v21  ;;  %v672_v9 = vadd.f32 %v667_v12, %v647_v24 }
 0x14e   : > { %v733_v3 = vpop.permute.xlu1 %732  ;;  %v735_v23 = vpop.permute.xlu0 %734  ;;  %v671_v28 = vadd.f32 %v666_v53, %v646_v40  ;;  %v696_v33 = vadd.f32 %v691_v19, %v672_v9 }
 0x14f   : > { %v739_v59 = vsel %vm738_vm3, %v733_v3, %v735_v23 }
 0x150   : > { %1271 = vrot.lane.b32.xlu1 %v1263_v48, %s4186_s28  ;;  %1332 = vperm.xlu0 %4022, %v1329_v43   ;;  %v695_v15 = vadd.f32 %v690_v22, %v671_v28  ;;  %v720_v37 = vadd.f32 %v715_v44, %v696_v33  ;;  %v1068_v48 = vmul.f32 %v4495_v8, %v4363_v1 }
 0x151   : > { %v1309_v1 = vmul.f32 %v4512_v16, %v4506_v13  ;;  %v1311_v8 = vmul.f32 %v4512_v16, %v4522_v32 }
 0x152   : > { %v737_v14 = vpop.permute.xlu1 %736  ;;  %v758_v26 = vpop.permute.xlu0 %757  ;;  %v719_v43 = vadd.f32 %v714_v60, %v695_v15 }
 0x153   : > { %v740_v27 = vsel %vm738_vm3, %v735_v23, %v737_v14  ;;  %v746_v56 = vadd.f32 %v737_v14, %v721_v4 }
 0x154   : > { %1049 = vrot.lane.b32.xlu1 %v1043_v0, %s4188_s11  ;;  %1051 = vrot.lane.b32.xlu0 %v1044_v11, %s4188_s11  ;;  %v745_v5 = vadd.f32 %v740_v27, %v720_v37  ;;  %v744_v52 = vadd.f32 %v739_v59, %v719_v43 }
 0x156   : > { %v760_v49 = vpop.permute.xlu1 %759  ;;  %v762_v51 = vpop.permute.xlu0 %761 }
 0x157   : > { %v764_v42 = vsel %vm738_vm3, %v760_v49, %v762_v51  ;;  %v763_v30 = vsel %vm738_vm3, %v758_v26, %v760_v49  ;;  %v770_v41 = vadd.f32 %v762_v51, %v746_v56 }
 0x158   : > { %1053 = vrot.lane.b32.xlu1 %v1045_v20, %s4188_s11  ;;  %1291 = vrot.lane.b32.xlu0 %v1285_v36, %s4187_s29  ;;  %v769_v45 = vadd.f32 %v764_v42, %v745_v5  ;;  %v768_v7 = vadd.f32 %v763_v30, %v744_v52 }
 0x15a   : > { %v782_v38 = vpop.permute.xlu1 %781  ;;  %v784_v55 = vpop.permute.xlu0 %783 }
 0x15b   : > { %v787_v50 = vsel %vm738_vm3, %v782_v38, %v784_v55 }
 0x15c   : > { %1293 = vrot.lane.b32.xlu1 %v1286_v39, %s4187_s29  ;;  %1295 = vrot.lane.b32.xlu0 %v1287_v31, %s4187_s29  ;;  %v792_v62 = vadd.f32 %v787_v50, %v768_v7 }
 0x15e   : > { %v786_v3 = vpop.permute.xlu1 %785  ;;  %v806_v23 = vpop.permute.xlu0 %805 }
 0x15f   : > { %v788_v57 = vsel %vm738_vm3, %v784_v55, %v786_v3  ;;  %v794_v58 = vadd.f32 %v786_v3, %v770_v41 }
 0x160   : > { %v793_v10 = vadd.f32 %v788_v57, %v769_v45  ;;  %1073 = vrot.lane.b32.xlu1 %v1067_v17, %s4188_s11  ;;  %1075 = vrot.lane.b32.xlu0 %v1068_v48, %s4188_s11 }
 0x162   : > { %v808_v35 = vpop.permute.xlu1 %807  ;;  %v810_v63 = vpop.permute.xlu0 %809 }
 0x163   : > { %v812_v0 = vsel %vm811_vm4, %v806_v23, %v808_v35  ;;  %v813_v11 = vsel %vm811_vm4, %v808_v35, %v810_v63  ;;  %v819_v34 = vadd.f32 %v810_v63, %v794_v58 }
 0x164   : > { %v817_v46 = vadd.f32 %v812_v0, %v792_v62  ;;  %v818_v14 = vadd.f32 %v813_v11, %v793_v10  ;;  %1077 = vrot.lane.b32.xlu1 %v1069_v61, %s4188_s11  ;;  %1315 = vrot.lane.b32.xlu0 %v1309_v1, %s4188_s11 }
 0x166   : > { %v831_v26 = vpop.permute.xlu0 %830 }
 0x168   : > { %1317 = vrot.lane.b32.xlu1 %v1310_v2, %s4188_s11  ;;  %1319 = vrot.lane.b32.xlu0 %v1311_v8, %s4188_s11 }
 0x16a   : > { %v835_v6 = vpop.permute.xlu0 %834 }
 0x16b   : > { %v843_v47 = vadd.f32 %v835_v6, %v819_v34 }
 0x16e   : > { %v857_v12 = vpop.permute.xlu0 %856 }
 0x172   : > { %v879_v21 = vpop.permute.xlu0 %878 }
 0x173   : > { %v1113_v24 = vpop.permute.xlu1 %1112 }
 0x174   : > { %v1133_v33 = vmul.f32 %v4522_v32, %v1113_v24  ;;  %v1131_v52 = vmul.f32 %v4506_v13, %v1113_v24  ;;  %v1132_v45 = vmul.f32 %v4519_v18, %v1113_v24 }
 0x176   : > { %v883_v53 = vpop.permute.xlu0 %882 }
 0x177   : > { %v833_v54 = vpop.permute.xlu1 %832 }
 0x178   : > { %v836_v19 = vsel %vm811_vm4, %v831_v26, %v833_v54  ;;  %v837_v20 = vsel %vm811_vm4, %v833_v54, %v835_v6 }
 0x179   : > { %v841_v36 = vadd.f32 %v836_v19, %v817_v46  ;;  %v842_v40 = vadd.f32 %v837_v20, %v818_v14 }
 0x17a   : > { %v906_v9 = vpop.permute.xlu0 %905 }
 0x17b   : > { %v855_v16 = vpop.permute.xlu1 %854 }
 0x17c   : > { %v860_v49 = vsel %vm811_vm4, %v855_v16, %v857_v12 }
 0x17d   : > { %v865_v51 = vadd.f32 %v860_v49, %v841_v36 }
 0x17e   : > { %v1148_v22 = vpop.permute.xlu0 %1147 }
 0x17f   : > { %v859_v25 = vpop.permute.xlu1 %858 }
 0x180   : > { %v861_v44 = vsel %vm811_vm4, %v857_v12, %v859_v25  ;;  %v867_v28 = vadd.f32 %v859_v25, %v843_v47 }
 0x181   : > { %v866_v60 = vadd.f32 %v861_v44, %v842_v40 }
 0x182   : > { %v1152_v4 = vpop.permute.xlu0 %1151  ;;  %v892_v27 = vadd.f32 %v883_v53, %v867_v28 }
 0x183   : > { %v1160_v39 = vadd.f32 %v1152_v4, %v1133_v33  ;;  %v881_v31 = vpop.permute.xlu1 %880 }
 0x184   : > { %v885_v15 = vsel %vm884_vm5, %v879_v21, %v881_v31  ;;  %v886_v37 = vsel %vm884_vm5, %v881_v31, %v883_v53 }
 0x185   : > { %v890_v38 = vadd.f32 %v885_v15, %v865_v51  ;;  %v891_v55 = vadd.f32 %v886_v37, %v866_v60 }
 0x186   : > { %v930_v59 = vpop.permute.xlu0 %929 }
 0x187   : > { %v904_v56 = vpop.permute.xlu1 %903 }
 0x188   : > { %v909_v42 = vsel %vm884_vm5, %v904_v56, %v906_v9 }
 0x189   : > { %v914_v43 = vadd.f32 %v909_v42, %v890_v38 }
 0x18a   : > { %v1172_v5 = vpop.permute.xlu0 %1171 }
 0x18b   : > { %v908_v30 = vpop.permute.xlu1 %907 }
 0x18c   : > { %v910_v32 = vsel %vm884_vm5, %v906_v9, %v908_v30  ;;  %v916_v41 = vadd.f32 %v908_v30, %v892_v27  ;;  %v364_v9 = vand.u32 127, %v363_v29 }
 0x18d   : > { %v915_v17 = vadd.f32 %v910_v32, %v891_v55 }
 0x18e   : > { %v1176_v48 = vpop.permute.xlu0 %1175  ;;  %v366_v49 = vadd.s32 256, %v364_v9  ;;  %v4867_v25 = vmul.u32.u64.low 3817748708, %v364_v9  ;;  %v4868_v44 = vmul.u32.u64.high 3817748708, %v364_v9, %v4867_v25  ;;  %v365_v27 = vadd.s32 128, %v364_v9 }
 0x18f   : > { %v4820_v3 = vadd.f32 %v1176_v48, %v1160_v39  ;;  %v1150_v23 = vpop.permute.xlu1 %1149 }
 0x190   : > { %v1153_v50 = vsel %vm519_vm0, %v1148_v22, %v1150_v23  ;;  %v1154_v57 = vsel %vm519_vm0, %v1150_v23, %v1152_v4  ;;  %v4870_v28 = vmul.u32.u64.low 3817748708, %v366_v49  ;;  %v4871_v33 = vmul.u32.u64.high 3817748708, %v366_v49, %v4870_v28 }
 0x191   : > { %v1158_v58 = vadd.f32 %v1153_v50, %v1131_v52  ;;  %v1159_v7 = vadd.f32 %v1154_v57, %v1132_v45  ;;  %v373_v31 = vshrl.u32 %v4868_v44, 4 }
 0x192   : > { %v4824_v10 = vpop.permute.xlu0 %953  ;;  %v4880_v15 = vmul.u32.u64.low 3817748708, %v365_v27  ;;  %v4881_v37 = vmul.u32.u64.high 3817748708, %v365_v27, %v4880_v15  ;;  %v395_v38 = vshrl.u32 %v4871_v33, 4 }
 0x193   : > { %v928_v61 = vpop.permute.xlu1 %927  ;;  %v374_v56 = vmul.u32 18, %v373_v31 }
 0x194   : > { %v933_v1 = vsel %vm884_vm5, %v928_v61, %v930_v59  ;;  %v396_v42 = vmul.u32 18, %v395_v38  ;;  %v384_v32 = vshrl.u32 %v4881_v37, 4 }
 0x195   : > { %v4827_v62 = vadd.f32 %v933_v1, %v914_v43  ;;  %v4892_v30 = vsub.s32 %v364_v9, %v374_v56 }
 0x196   : > { %v4829_v35 = vpop.permute.xlu0 %1195  ;;  %v385_v52 = vmul.u32 18, %v384_v32 }
 0x197   : > { %v932_v13 = vpop.permute.xlu1 %931  ;;  %vm400_vm7 = vcmp.ne.s32.totalorder %v4892_v30, 0  ;;  %vm403_vm8 = vcmp.lt.s32.totalorder %v4892_v30, 0  ;;  %v4904_v23 = vadd.s32 18, %v4892_v30 }
 0x198   : > { %v934_v18 = vsel %vm884_vm5, %v930_v59, %v932_v13  ;;  %v4832_v63 = vadd.f32 %v932_v13, %v916_v41  ;;  %v4895_v41 = vsub.s32 %v366_v49, %v396_v42  ;;  %vm4909_vm11 = vmand %vm403_vm8, %vm400_vm7 }
 0x199   : > { %v4834_v0 = vadd.f32 %v934_v18, %v915_v17  ;;  %v4921_v18 = vsub.s32 %v365_v27, %v385_v52 }
 0x19a   : > { %v4836_v11 = vpop.permute.xlu0 %1199  ;;  %vm402_vm9 = vcmp.ne.s32.totalorder %v4895_v41, 0  ;;  %vm405_vm10 = vcmp.lt.s32.totalorder %v4895_v41, 0  ;;  %v4907_v50 = vadd.s32 18, %v4895_v41 }
 0x19b   : > { %v1174_v34 = vpop.permute.xlu1 %1173  ;;  %vm4917_vm12 = vmand %vm405_vm10, %vm402_vm9  ;;  %vm401_vm14 = vcmp.ne.s32.totalorder %v4921_v18, 0  ;;  %vm404_vm15 = vcmp.lt.s32.totalorder %v4921_v18, 0  ;;  %vm1346_vm9 = vcmask 703488  }
 0x19c   : > { %v1177_v46 = vsel %vm592_vm1, %v1172_v5, %v1174_v34  ;;  %v1178_v14 = vsel %vm592_vm1, %v1174_v34, %v1176_v48  ;;  %vm5004_vm8 = vmand %vm404_vm15, %vm401_vm14  ;;  %vm3424_vm14 = vcmask 261120   ;;  %vm1360_vm15 = vcmask 154624  }
 0x19d   : > { %v4840_v2 = vadd.f32 %v1177_v46, %v1158_v58  ;;  %v4842_v8 = vadd.f32 %v1178_v14, %v1159_v7 }
 0x19e   : > { %v979_v26 = vpop.permute.xlu0 %978 }
 0x19f   : > { %v952_v6 = vpop.permute.xlu1 %951 }
 0x1a0   : > { %v958_v45 = vsel %vm957_vm6, %v952_v6, %v4824_v10 }
 0x1a1   : > { %v963_v34 = vadd.f32 %v958_v45, %v4827_v62 }
 0x1a2   : > { %v4846_v12 = vpop.permute.xlu0 %1219 }
 0x1a3   : > { %v4844_v47 = vpop.permute.xlu1 %955 }
 0x1a4   : > { %v959_v58 = vsel %vm957_vm6, %v4824_v10, %v4844_v47  ;;  %v1208_v10 = vadd.f32 %v4836_v11, %v4820_v3  ;;  %v414_v3 = vsel %vm4917_vm12, %v4907_v50, %v4895_v41 }
 0x1a5   : > { %v964_v62 = vadd.f32 %v959_v58, %v4834_v0  ;;  %vm4996_vm7 = vcmp.lt.s32.totalorder %v414_v3, 16 }
 0x1a6   : > { %v4850_v24 = vpop.permute.xlu0 %1223 }
 0x1a7   : > { %v4848_v21 = vpop.permute.xlu1 %1197 }
 0x1a8   : > { %v1201_v46 = vsel %vm665_vm2, %v4829_v35, %v4848_v21  ;;  %v965_v35 = vadd.f32 %v4844_v47, %v4832_v63 }
 0x1a9   : > { %v1206_v49 = vadd.f32 %v1201_v46, %v4840_v2 }
 0x1aa   : > { %v4854_v19 = vpop.permute.xlu0 %1002 }
 0x1ab   : > { %v977_v53 = vpop.permute.xlu1 %976 }
 0x1ac   : > { %v982_v7 = vsel %vm957_vm6, %v977_v53, %v979_v26  ;;  %v412_v53 = vsel %vm4909_vm11, %v4904_v23, %v4892_v30  ;;  %vm1366_vm11 = vcmask 1047704  }
 0x1ad   : > { %v987_v9 = vadd.f32 %v982_v7, %v963_v34  ;;  %vm415_vm10 = vcmp.lt.s32.totalorder %v412_v53, 16 }
 0x1ae   : > { %v4858_v36 = vpop.permute.xlu0 %1243 }
 0x1af   : > { %v4852_v54 = vpop.permute.xlu1 %980 }
 0x1b0   : > { %v983_v14 = vsel %vm957_vm6, %v979_v26, %v4852_v54  ;;  %v1232_v26 = vadd.f32 %v4850_v24, %v1208_v10  ;;  %v989_v47 = vadd.f32 %v4852_v54, %v965_v35 }
 0x1b1   : > { %v988_v63 = vadd.f32 %v983_v14, %v964_v62 }
 0x1b2   : > { %v4863_v51 = vpop.permute.xlu0 %1247 }
 0x1b3   : > { %v4856_v20 = vpop.permute.xlu1 %1221 }
 0x1b4   : > { %v1226_v2 = vsel %vm738_vm3, %v4856_v20, %v4850_v24 }
 0x1b6   : > { %v4873_v60 = vpop.permute.xlu0 %1026 }
 0x1b7   : > { %v1001_v40 = vpop.permute.xlu1 %1000 }
 0x1b8   : > { %v1006_v6 = vsel %vm957_vm6, %v1001_v40, %v4854_v19  ;;  %v1202_v40 = vsel %vm665_vm2, %v4848_v21, %v4836_v11  ;;  %v1225_v11 = vsel %vm738_vm3, %v4846_v12, %v4856_v20 }
 0x1b9   : > { %v1011_v28 = vadd.f32 %v1006_v6, %v987_v9  ;;  %v1207_v12 = vadd.f32 %v1202_v40, %v4842_v8  ;;  %v1256_v8 = vadd.f32 %v4863_v51, %v1232_v26  ;;  %v1230_v42 = vadd.f32 %v1225_v11, %v1206_v49 }
 0x1bb   : > { %v4861_v16 = vpop.permute.xlu1 %1004  ;;  %v1231_v32 = vadd.f32 %v1226_v2, %v1207_v12 }
 0x1bc   : > { %v1007_v33 = vsel %vm957_vm6, %v4854_v19, %v4861_v16  ;;  %v4189_v19 = vmov 0.0  }
 0x1bd   : > { %1344 = vst [vmem:[#allocation2] sm:$0xff] %v4189_v19  ;;  %1348 = vst [vmem:[#allocation2 + $0x18] sm:$0xff] %v4189_v19  ;;  %1905 = vmatprep.mubr.f32.mxu0 %v4189_v19  ;;  %1507 = vmatprep.mubr.f32.mxu1 %v4189_v19  ;;  %v1012_v24 = vadd.f32 %v1007_v33, %v988_v63 }
 0x1be   : > { %1347 = vst.msk [vmem:[#allocation2 + $0x10] sm:$0xff] %vm1346_vm9, %v4189_v19  ;;  %1350 = vst.msk [vmem:[#allocation2 + $0x28] sm:$0xff] %vm1346_vm9, %v4189_v19 }
 0x1bf   : > { %v4865_v22 = vpop.permute.xlu1 %1245 }
 0x1c0   : > { %v1249_v20 = vsel %vm811_vm4, %v4858_v36, %v4865_v22 }
 0x1c1   : > { %v1254_v52 = vadd.f32 %v1249_v20, %v1230_v42 }
 0x1c3   : > { %v1025_v4 = vpop.permute.xlu1 %1024 }
 0x1c4   : > { %v1031_v0 = vsel %vm1030_vm13, %v1025_v4, %v4873_v60  ;;  %v1013_v4 = vadd.f32 %v4861_v16, %v989_v47  ;;  %v1250_v16 = vsel %vm811_vm4, %v4865_v22, %v4863_v51 }
 0x1c5   : > { %v1036_v27 = vadd.f32 %v1031_v0, %v1011_v28  ;;  %v1255_v45 = vadd.f32 %v1250_v16, %v1231_v32 }
 0x1c7   : > { %v4875_v39 = vpop.permute.xlu1 %1028  ;;  %v4877_v29 = vpop.permute.xlu0 %1090 }
 0x1c8   : > { %v1032_v54 = vsel %vm1030_vm13, %v4873_v60, %v4875_v39  ;;  %v1038_v15 = vadd.f32 %v4875_v39, %v1013_v4 }
 0x1c9   : > { %v1037_v41 = vadd.f32 %v1032_v54, %v1012_v24 }
 0x1cb   : > { %v4884_v55 = vpop.permute.xlu1 %1267  ;;  %v4886_v59 = vpop.permute.xlu0 %1269 }
 0x1cc   : > { %v1273_v36 = vsel %vm884_vm5, %v4884_v55, %v4886_v59 }
 0x1cd   : > { %v1278_v46 = vadd.f32 %v1273_v36, %v1254_v52 }
 0x1cf   : > { %v4888_v43 = vpop.permute.xlu1 %1271  ;;  %v4890_v5 = vpop.permute.xlu0 %1332 }
 0x1d0   : > { %v1274_v22 = vsel %vm884_vm5, %v4886_v59, %v4888_v43  ;;  %v410_v59 = vadd.s32 18, %v4921_v18 }
 0x1d1   : > { %v1279_v10 = vadd.f32 %v1274_v22, %v1255_v45 }
 0x1d3   : > { %v1050_v17 = vpop.permute.xlu1 %1049  ;;  %v1052_v48 = vpop.permute.xlu0 %1051 }
 0x1d4   : > { %v1055_v21 = vsel %vm1030_vm13, %v1050_v17, %v1052_v48 }
 0x1d5   : > { %v1060_v37 = vadd.f32 %v1055_v21, %v1036_v27 }
 0x1d7   : > { %v1054_v61 = vpop.permute.xlu1 %1053  ;;  %v1292_v1 = vpop.permute.xlu0 %1291 }
 0x1d8   : > { %v1056_v38 = vsel %vm1030_vm13, %v1052_v48, %v1054_v61  ;;  %v1062_v17 = vadd.f32 %v1054_v61, %v1038_v15  ;;  %v1280_v48 = vadd.f32 %v4888_v43, %v1256_v8 }
 0x1d9   : > { %v1061_v50 = vadd.f32 %v1056_v38, %v1037_v41 }
 0x1db   : > { %v1294_v25 = vpop.permute.xlu1 %1293  ;;  %v1296_v44 = vpop.permute.xlu0 %1295 }
 0x1dc   : > { %v1297_v7 = vsel %vm957_vm6, %v1292_v1, %v1294_v25  ;;  %v1298_v13 = vsel %vm957_vm6, %v1294_v25, %v1296_v44  ;;  %v1304_v61 = vadd.f32 %v1296_v44, %v1280_v48 }
 0x1dd   : > { %v1302_v35 = vadd.f32 %v1297_v7, %v1278_v46  ;;  %v1303_v9 = vadd.f32 %v1298_v13, %v1279_v10  ;;  %v3373_v7 = vld [vmem:[%s5549_s7 + $0x10] sm:$0xff]  ;;  %v3372_v13 = vld [vmem:[%s5549_s7 + $0x8] sm:$0xff] }
 0x1df   : > { %v1074_v60 = vpop.permute.xlu1 %1073  ;;  %v1076_v31 = vpop.permute.xlu0 %1075 }
 0x1e0   : > { %v1079_v56 = vsel %vm1030_vm13, %v1074_v60, %v1076_v31 }
 0x1e1   : > { %v1084_v39 = vadd.f32 %v1079_v56, %v1060_v37 }
 0x1e3   : > { %v1078_v58 = vpop.permute.xlu1 %1077  ;;  %v1316_v51 = vpop.permute.xlu0 %1315  ;;  %v1093_v6 = vadd.f32 %v4877_v29, %v1084_v39 }
 0x1e4   : > { %v1080_v34 = vsel %vm1030_vm13, %v1076_v31, %v1078_v58  ;;  %v1086_v55 = vadd.f32 %v1078_v58, %v1062_v17 }
 0x1e5   : > { %v1085_v14 = vadd.f32 %v1080_v34, %v1061_v50  ;;  %v1096_v28 = vmax.f32 %v1093_v6, 0.0  ;;  %v3374_v34 = vld [vmem:[%s5549_s7 + $0x18] sm:$0xff] }
 0x1e6   : > { %v1095_v43 = vadd.f32 %v4877_v29, %v1086_v55 }
 0x1e7   : > { %v1094_v26 = vadd.f32 %v4877_v29, %v1085_v14  ;;  %v1318_v40 = vpop.permute.xlu1 %1317  ;;  %v1320_v49 = vpop.permute.xlu0 %1319  ;;  %v413_v29 = vsel %vm5004_vm8, %v410_v59, %v4921_v18  ;;  %v1105_v12 = vsel %vm415_vm10, %v1096_v28, 0.0  ;;  %vm1430_vm8 = vcmask 130048  }
 0x1e8   : > { %v1098_v3 = vmax.f32 %v1095_v43, 0.0  ;;  %v1321_v0 = vsel %vm1030_vm13, %v1316_v51, %v1318_v40  ;;  %v1322_v25 = vsel %vm1030_vm13, %v1318_v40, %v1320_v49  ;;  %v1328_v44 = vadd.f32 %v1320_v49, %v1304_v61  ;;  %v3371_v51 = vld [vmem:[%s5549_s7] sm:$0xff] }
 0x1e9   : > { %v1326_v63 = vadd.f32 %v1321_v0, %v1302_v35  ;;  %v1327_v47 = vadd.f32 %v1322_v25, %v1303_v9  ;;  %v1097_v2 = vmax.f32 %v1094_v26, 0.0  ;;  %vm416_vm12 = vcmp.lt.s32.totalorder %v413_v29, 16 }
 0x1ea   : > { %v1337_v33 = vadd.f32 %v4890_v5, %v1328_v44  ;;  %v1107_v11 = vsel %vm4996_vm7, %v1098_v3, 0.0 }
 0x1eb   : > { %v1335_v21 = vadd.f32 %v4890_v5, %v1326_v63  ;;  %v1336_v4 = vadd.f32 %v4890_v5, %v1327_v47  ;;  %1358 = vrot.lane.b32.xlu1 %v1107_v11, %s4190_s17  ;;  %v1106_v20 = vsel %vm416_vm12, %v1097_v2, 0.0 }
 0x1ec   : > { %v1340_v18 = vmax.f32 %v1337_v33, 0.0 }
 0x1ed   : > { %v1338_v27 = vmax.f32 %v1335_v21, 0.0  ;;  %v1339_v54 = vmax.f32 %v1336_v4, 0.0 }
 0x1ee   : > { %v1343_v5 = vsel %vm4996_vm7, %v1340_v18, 0.0  ;;  %vm1369_vm7 = vcmask 416768  }
 0x1ef   : > { %1354 = vrot.lane.b32.xlu1 %v1105_v12, %s4190_s17  ;;  %v1341_v24 = vsel %vm415_vm10, %v1338_v27, 0.0  ;;  %v1342_v57 = vsel %vm416_vm12, %v1339_v54, 0.0  ;;  %v3421_v16 = vadd.f32 %v1343_v5, %v1107_v11  ;;  %v5116_v11 = vld [vmem:[%s5548_s6 + $0x40] sm:$0xff] }
 0x1f0   : > { %1374 = vrot.lane.b32.xlu0 %v1341_v24, %s4190_s17  ;;  %v3419_v30 = vadd.f32 %v1341_v24, %v1105_v12  ;;  %v3420_v23 = vadd.f32 %v1342_v57, %v1106_v20 }
 0x1f1   : > { %3425 = vst.msk [vmem:[%s357_s25 + $0x10] sm:$0xff] %vm3424_vm14, %v3421_v16 }
 0x1f2   : > { %3422 = vst [vmem:[%s357_s25] sm:$0xff] %v3419_v30  ;;  %3423 = vst [vmem:[%s357_s25 + $0x8] sm:$0xff] %v3420_v23 }
 0x1f3   : > { %1376 = vrot.lane.b32.xlu1 %v1342_v57, %s4190_s17 }
 0x1f4   : > { %1356 = vrot.lane.b32.xlu0 %v1106_v20, %s4190_s17  ;;  %v5128_v20 = vld [vmem:[%s5548_s6 + $0x48] sm:$0xff] }
 0x1f8   : > { %1378 = vrot.lane.b32.xlu0 %v1343_v5, %s4190_s17 }
 0x25d   : > { %v1359_v53 = vpop.permute.xlu1 %1358 }
 0x261   : > { %v1355_v60 = vpop.permute.xlu1 %1354 }
 0x262   : > { %1367 = vst.msk [vmem:[#allocation2] sm:$0xff] %vm1366_vm11, %v1355_v60  ;;  %v1375_v31 = vpop.permute.xlu0 %1374 }
 0x263   : > { %1385 = vst.msk [vmem:[#allocation2 + $0x18] sm:$0xff] %vm1366_vm11, %v1375_v31 }
 0x265   : > { %v1377_v15 = vpop.permute.xlu1 %1376 }
 0x266   : > { %v5033_v37 = vsel %vm1360_vm15, %v1375_v31, %v1377_v15  ;;  %v1357_v38 = vpop.permute.xlu0 %1356 }
 0x267   : > { %v5035_v56 = vsel %vm1360_vm15, %v1355_v60, %v1357_v38  ;;  %v1362_v8 = vsel %vm1360_vm15, %v1357_v38, %v1359_v53 }
 0x268   : > { %1370 = vst.msk [vmem:[#allocation2 + $0x10] sm:$0xff] %vm1369_vm7, %v1362_v8  ;;  %v3774_v42 = vpack.c.bf16 %v5033_v37, %v5035_v56  ;;  %v1398_v8 = vld [vmem:[%s5548_s6 + $0x20] sm:$0xff] }
 0x269   : > { %v5039_v32 = vld [vmem:[#allocation2] sm:$0xff] }
 0x26a   : > { %v1379_v41 = vpop.permute.xlu0 %1378  ;;  %v5041_v36 = vld [vmem:[#allocation2 + $0x18] sm:$0xff] }
 0x26b   : > { %v1381_v22 = vsel %vm1360_vm15, %v1377_v15, %v1379_v41  ;;  %v4031_v17 = vpack.i.bf16 %v5041_v36, %v5039_v32  ;;  %v3776_v39 = vpack.c.bf16 %v5041_v36, %v5039_v32 }
 0x26c   : > { %1387 = vst.msk [vmem:[#allocation2 + $0x28] sm:$0xff] %vm1369_vm7, %v1381_v22 }
 0x26d   : > { %4032 = vrot.lane.b32.xlu1 %v4031_v17, %s4182_s20 }
 0x26f   : > { %v1390_v52 = vld [vmem:[#allocation2 + $0x10] sm:$0xff] }
 0x270   : > { %v4036_v45 = vpack.i.bf16 %v1390_v52, %v5035_v56 }
 0x272   : > { %4037 = vrot.lane.b32.xlu1 %v4036_v45, %s4182_s20 }
 0x273   : > { %v1393_v48 = vld [vmem:[#allocation2 + $0x28] sm:$0xff] }
 0x274   : > { %v4041_v50 = vpack.i.bf16 %v1393_v48, %v5033_v37  ;;  %v5051_v58 = vpack.c.bf16 %v1393_v48, %v1390_v52 }
 0x276   : > { %4042 = vrot.lane.b32.xlu1 %v4041_v50, %s4181_s19  ;;  %4027 = vrot.lane.b32.xlu0 %v4041_v50, %s4182_s20 }
 0x27a   : > { %4062 = vrot.lane.b32.xlu1 %v4036_v45, %s4183_s21  ;;  %4047 = vrot.lane.b32.xlu0 %v4036_v45, %s4181_s19 }
 0x27e   : > { %4067 = vrot.lane.b32.xlu1 %v4031_v17, %s4183_s21  ;;  %4052 = vrot.lane.b32.xlu0 %v4031_v17, %s4181_s19 }
 0x282   : > { %4072 = vrot.lane.b32.xlu1 %v4041_v50, %s4184_s22  ;;  %4057 = vrot.lane.b32.xlu0 %v4041_v50, %s4183_s21 }
 0x286   : > { %4092 = vrot.lane.b32.xlu1 %v4036_v45, %s4185_s23  ;;  %4077 = vrot.lane.b32.xlu0 %v4036_v45, %s4184_s22 }
 0x28a   : > { %4097 = vrot.lane.b32.xlu1 %v4031_v17, %s4185_s23  ;;  %4082 = vrot.lane.b32.xlu0 %v4031_v17, %s4184_s22 }
 0x28e   : > { %4102 = vrot.lane.b32.xlu1 %v4041_v50, %s4186_s28  ;;  %4087 = vrot.lane.b32.xlu0 %v4041_v50, %s4185_s23  ;;  %s3939_s23 = smul.u32 48, %s5561_s10 }
 0x292   : > { %4122 = vrot.lane.b32.xlu1 %v4036_v45, %s4187_s29  ;;  %4107 = vrot.lane.b32.xlu0 %v4036_v45, %s4186_s28 }
 0x296   : > { %4127 = vrot.lane.b32.xlu1 %v4031_v17, %s4187_s29  ;;  %4112 = vrot.lane.b32.xlu0 %v4031_v17, %s4186_s28  ;;  %s5529_s28 = scalar_lea.vmem %s5551_s9, %s3939_s23 }
 0x29a   : > { %4132 = vrot.lane.b32.xlu1 %v4041_v50, %s4188_s11  ;;  %4117 = vrot.lane.b32.xlu0 %v4041_v50, %s4187_s29 }
 0x29e   : > { %3377 = vperm.xlu1 %4025, %v3371_v51   ;;  %4137 = vrot.lane.b32.xlu0 %v4036_v45, %s4188_s11  ;;  %v5152_v45 = vld [vmem:[%s5548_s6 + $0x50] sm:$0xff] }
 0x2a2   : > { %3387 = vperm.xlu1 %4025, %v3373_v7   ;;  %4142 = vrot.lane.b32.xlu0 %v4031_v17, %s4188_s11 }
 0x2a6   : > { %3382 = vperm.xlu0 %4022, %v3372_v13  }
 0x2aa   : > { %3392 = vperm.xlu0 %4022, %v3374_v34  }
 0x2df   : > { %v4033_v55 = vpop.permute.xlu1 %4032 }
 0x2e0   : > { %v4034_v59 = vunpack.i.l.bf16 %v4033_v55  ;;  %v4035_v43 = vunpack.i.h.bf16 %v4033_v55  ;;  %v1399_v55 = vld [vmem:[%s5548_s6 + $0x28] sm:$0xff] }
 0x2e4   : > { %v5087_v46 = vpop.permute.xlu1 %4037 }
 0x2e5   : > { %v4040_v10 = vunpack.i.h.bf16 %v5087_v46  ;;  %v4039_v14 = vunpack.i.l.bf16 %v5087_v46  ;;  %v5358_v46 = vld [vmem:[%s5548_s6 + $0xb0] sm:$0xff] }
 0x2e7   : > { %v1820_v35 = vsel %vm592_vm1, %v4039_v14, %v4040_v10  ;;  %v1819_v9 = vsel %vm592_vm1, %v4034_v59, %v4039_v14 }
 0x2e8   : > { %v5091_v61 = vpop.permute.xlu0 %4027  ;;  %v4043_v6 = vpop.permute.xlu1 %4042 }
 0x2e9   : > { %v4030_v62 = vunpack.i.h.bf16 %v5091_v61  ;;  %v4029_v1 = vunpack.i.l.bf16 %v5091_v61  ;;  %v4045_v26 = vunpack.i.h.bf16 %v4043_v6  ;;  %v4044_v40 = vunpack.i.l.bf16 %v4043_v6  ;;  %v1806_v61 = vld [vmem:[%s5548_s6 + $0x58] sm:$0xff] }
 0x2eb   : > { %v1822_v49 = vsel %vm592_vm1, %v4029_v1, %v4030_v62  ;;  %v1821_v3 = vsel %vm592_vm1, %v4035_v43, %v4029_v1  ;;  %v1423_v33 = vsel %vm519_vm0, %v4044_v40, %v4045_v26  ;;  %v5182_v1 = vld [vmem:[%s5548_s6 + $0x60] sm:$0xff] }
 0x2ec   : > { %v4048_v0 = vpop.permute.xlu0 %4047  ;;  %v5103_v25 = vpop.permute.xlu1 %4062  ;;  %v5105_v44 = vpack.c.bf16 %v1822_v49, %v1820_v35  ;;  %v5107_v63 = vpack.c.bf16 %v1821_v3, %v1819_v9 }
 0x2ed   : > { %v4050_v47 = vunpack.i.h.bf16 %v4048_v0  ;;  %v4049_v29 = vunpack.i.l.bf16 %v4048_v0  ;;  %v4065_v54 = vunpack.i.h.bf16 %v5103_v25  ;;  %v4064_v12 = vunpack.i.l.bf16 %v5103_v25  ;;  %v5395_v25 = vld [vmem:[%s5548_s6 + $0xc0] sm:$0xff] }
 0x2ee   : > { %3783 = vmatprep.subr.bf16.mxu0 %v5105_v44 }
 0x2ef   : > { %3785 = vmatpush1.bf16.msra.mxu0 %v5107_v63  ;;  %v1421_v28 = vsel %vm519_vm0, %v4049_v29, %v4050_v47  ;;  %v3770_v53 = vpack.c.bf16 %v4045_v26, %v4050_v47  ;;  %v2044_v41 = vsel %vm665_vm2, %v4064_v12, %v4065_v54  ;;  %v5202_v47 = vld [vmem:[%s5548_s6 + $0x68] sm:$0xff] }
 0x2f0   : > { %v4053_v2 = vpop.permute.xlu0 %4052  ;;  %v4068_v21 = vpop.permute.xlu1 %4067  ;;  %v3766_v4 = vpack.c.bf16 %v1423_v33, %v1421_v28 }
 0x2f1   : > { %v4055_v18 = vunpack.i.h.bf16 %v4053_v2  ;;  %v4054_v27 = vunpack.i.l.bf16 %v4053_v2  ;;  %v4069_v5 = vunpack.i.l.bf16 %v4068_v21  ;;  %v4070_v60 = vunpack.i.h.bf16 %v4068_v21  ;;  %v1401_v2 = vld [vmem:[%s5548_s6 + $0x38] sm:$0xff] }
 0x2f2   : > { %3767 = vmatprep.subr.bf16.mxu1 %v3766_v4  ;;  %3564 = vmatmul.mubr.msk.f32.vlgmr.msra.gmra.mrb[0].mxu0 %vm1430_vm8, %v5116_v11 }
 0x2f3   : > { %1911 = vmatprep.mubr.f32.mxu0 %v4189_v19  ;;  %v1420_v24 = vsel %vm519_vm0, %v4054_v27, %v4049_v29  ;;  %v1422_v57 = vsel %vm519_vm0, %v4055_v18, %v4044_v40  ;;  %v2043_v38 = vsel %vm665_vm2, %v4069_v5, %v4064_v12  ;;  %v5223_v18 = vld [vmem:[%s5548_s6 + $0x70] sm:$0xff] }
 0x2f4   : > { %v5130_v16 = vpop.permute.xlu0 %4057  ;;  %v5132_v30 = vpop.permute.xlu1 %4072  ;;  %v3768_v23 = vpack.c.bf16 %v1422_v57, %v1420_v24 }
 0x2f5   : > { %v4060_v31 = vunpack.i.h.bf16 %v5130_v16  ;;  %v4059_v15 = vunpack.i.l.bf16 %v5130_v16  ;;  %v4075_v17 = vunpack.i.h.bf16 %v5132_v30  ;;  %v4074_v52 = vunpack.i.l.bf16 %v5132_v30 }
 0x2f6   : > { %3769 = vmatpush1.bf16.msra.mxu1 %v3768_v23  ;;  %3565 = vmatmul.mubr.msk.f32.gmra.mrb[2].mxu0 %vm1430_vm8, %v5128_v20  ;;  %v5239_v23 = vld [vmem:[%s5548_s6 + $0x78] sm:$0xff] }
 0x2f7   : > { %v2045_v22 = vsel %vm665_vm2, %v4070_v60, %v4059_v15  ;;  %3771 = vmatprep.subr.bf16.mxu1 %v3770_v53  ;;  %1917 = vmatprep.mubr.f32.mxu0 %v4189_v19  ;;  %v2046_v48 = vsel %vm665_vm2, %v4059_v15, %v4060_v31  ;;  %v2270_v6 = vsel %vm738_vm3, %v4074_v52, %v4075_v17 }
 0x2f8   : > { %v3792_v50 = vpack.c.bf16 %v2045_v22, %v2043_v38  ;;  %v5157_v51 = vpop.permute.xlu0 %4077  ;;  %v3790_v7 = vpack.c.bf16 %v2046_v48, %v2044_v41  ;;  %v5167_v14 = vpop.permute.xlu1 %4092  ;;  %v5256_v41 = vld [vmem:[%s5548_s6 + $0x80] sm:$0xff] }
 0x2f9   : > { %v4080_v13 = vunpack.i.h.bf16 %v5157_v51  ;;  %v4079_v34 = vunpack.i.l.bf16 %v5157_v51  ;;  %3548 = vmatmul.mubr.msk.f32.vlgmr.msra.gmra.mrb[0].mxu1 %vm1430_vm8, %v1398_v8  ;;  %v4095_v9 = vunpack.i.h.bf16 %v5167_v14  ;;  %v4094_v26 = vunpack.i.l.bf16 %v5167_v14  ;;  %v2702_v14 = vld [vmem:[%s5548_s6 + $0xd8] sm:$0xff] }
 0x2fa   : > { %3773 = vmatpush3.bf16.msra.mxu1 %v3770_v53  ;;  %3566 = vmatmul.mubr.msk.f32.gmra.mrb[4].mxu0 %vm1430_vm8, %v5152_v45 }
 0x2fb   : > { %3791 = vmatprep.subr.bf16.mxu0 %v3790_v7  ;;  %3775 = vmatprep.subr.bf16.mxu1 %v3774_v42  ;;  %v2268_v59 = vsel %vm738_vm3, %v4079_v34, %v4080_v13  ;;  %v1400_v42 = vld [vmem:[%s5548_s6 + $0x30] sm:$0xff]  ;;  %v2492_v21 = vsel %vm811_vm4, %v4094_v26, %v4095_v9  ;;  %v5276_v7 = vld [vmem:[%s5548_s6 + $0x88] sm:$0xff] }
 0x2fc   : > { %3793 = vmatpush1.bf16.msra.mxu0 %v3792_v50  ;;  %v4083_v43 = vpop.permute.xlu0 %4082  ;;  %1513 = vmatprep.mubr.f32.mxu1 %v4189_v19  ;;  %v3798_v35 = vpack.c.bf16 %v2270_v6, %v2268_v59  ;;  %v4098_v29 = vpop.permute.xlu1 %4097 }
 0x2fd   : > { %v4085_v37 = vunpack.i.h.bf16 %v4083_v43  ;;  %v4084_v56 = vunpack.i.l.bf16 %v4083_v43  ;;  %3549 = vmatmul.mubr.msk.f32.gmra.mrb[2].mxu1 %vm1430_vm8, %v1399_v55  ;;  %2129 = vmatprep.mubr.f32.mxu0 %v4189_v19  ;;  %v4100_v53 = vunpack.i.h.bf16 %v4098_v29  ;;  %v4099_v60 = vunpack.i.l.bf16 %v4098_v29  ;;  %v5327_v29 = vld [vmem:[%s5548_s6 + $0xa0] sm:$0xff] }
 0x2fe   : > { %3799 = vmatprep.subr.bf16.mxu0 %v3798_v35  ;;  %1519 = vmatprep.mubr.f32.mxu1 %v4189_v19 }
 0x2ff   : > { %v2267_v40 = vsel %vm738_vm3, %v4084_v56, %v4079_v34  ;;  %v2269_v49 = vsel %vm738_vm3, %v4085_v37, %v4074_v52  ;;  %3572 = vmatmul.mubr.msk.f32.vlgmr.msra.gmra.mrb[0].mxu0 %vm1430_vm8, %v5182_v1  ;;  %v2491_v36 = vsel %vm811_vm4, %v4099_v60, %v4094_v26  ;;  %v1394_v52 = vld [vmem:[%s5548_s6] sm:$0xff]  ;;  %v1395_v34 = vld [vmem:[%s5548_s6 + $0x8] sm:$0xff]  ;;  %v5310_v56 = vld [vmem:[%s5548_s6 + $0x98] sm:$0xff] }
 0x300   : > { %v3800_v3 = vpack.c.bf16 %v2269_v49, %v2267_v40  ;;  %v5196_v0 = vpop.permute.xlu0 %4087  ;;  %2135 = vmatprep.mubr.f32.mxu0 %v4189_v19  ;;  %v5229_v5 = vpop.permute.xlu1 %4102  ;;  %v1397_v40 = vld [vmem:[%s5548_s6 + $0x18] sm:$0xff] }
 0x301   : > { %v4090_v28 = vunpack.i.h.bf16 %v5196_v0  ;;  %v4089_v33 = vunpack.i.l.bf16 %v5196_v0  ;;  %3550 = vmatmul.mubr.msk.f32.gmra.mrb[4].mxu1 %vm1430_vm8, %v1400_v42  ;;  %v4105_v15 = vunpack.i.h.bf16 %v5229_v5  ;;  %v4104_v38 = vunpack.i.l.bf16 %v5229_v5  ;;  %v2925_v5 = vld [vmem:[%s5548_s6 + $0xf0] sm:$0xff] }
 0x302   : > { %3801 = vmatpush1.bf16.msra.mxu0 %v3800_v3  ;;  %1525 = vmatprep.mubr.f32.mxu1 %v4189_v19 }
 0x303   : > { %3573 = vmatmul.mubr.msk.f32.gmra.mrb[2].mxu0 %vm1430_vm8, %v5202_v47  ;;  %v2494_v4 = vsel %vm811_vm4, %v4089_v33, %v4090_v28  ;;  %v2718_v22 = vsel %vm884_vm5, %v4104_v38, %v4105_v15  ;;  %v3810_v51 = vpack.c.bf16 %v4090_v28, %v4095_v9 }
 0x304   : > { %2141 = vmatprep.mubr.f32.mxu0 %v4189_v19  ;;  %v3806_v27 = vpack.c.bf16 %v2494_v4, %v2492_v21  ;;  %v5225_v12 = vpop.permute.xlu0 %4107 }
 0x305   : > { %3551 = vmatmul.mubr.msk.f32.gmra.mrb[6].mxu1 %vm1430_vm8, %v1401_v2  ;;  %v4110_v24 = vunpack.i.h.bf16 %v5225_v12  ;;  %v4109_v57 = vunpack.i.l.bf16 %v5225_v12  ;;  %v2924_v12 = vld [vmem:[%s5548_s6 + $0xe8] sm:$0xff] }
 0x306   : > { %3807 = vmatprep.subr.bf16.mxu0 %v3806_v27  ;;  %3680 = vmatprep.mubr.msk.f32.mxu1 %vm1430_vm8, %v1398_v8  ;;  %v2493_v8 = vsel %vm811_vm4, %v4100_v53, %v4089_v33  ;;  %v5343_v27 = vld [vmem:[%s5548_s6 + $0xa8] sm:$0xff] }
 0x307   : > { %3574 = vmatmul.mubr.msk.f32.gmra.mrb[4].mxu0 %vm1430_vm8, %v5223_v18  ;;  %v2716_v32 = vsel %vm884_vm5, %v4109_v57, %v4110_v24  ;;  %v3818_v28 = vpack.c.bf16 %v4105_v15, %v4110_v24  ;;  %v3147_v15 = vld [vmem:[%s5548_s6 + $0x100] sm:$0xff] }
 0x308   : > { %2147 = vmatprep.mubr.f32.mxu0 %v4189_v19  ;;  %v4113_v48 = vpop.permute.xlu0 %4112  ;;  %v3814_v50 = vpack.c.bf16 %v2718_v22, %v2716_v32 }
 0x309   : > { %3681 = vmatmul.mubr.msk.f32.vlgmr.msra.gmra.mrb[8].mxu1 %vm1430_vm8, %v1399_v55  ;;  %v5291_v55 = vld [vmem:[%s5548_s6 + $0x90] sm:$0xff]  ;;  %v4115_v6 = vunpack.i.h.bf16 %v4113_v48  ;;  %v4114_v43 = vunpack.i.l.bf16 %v4113_v48 }
 0x30a   : > { %3777 = vmatpush1.bf16.msra.mxu1 %v3776_v39  ;;  %3683 = vmatprep.mubr.msk.f32.mxu1 %vm1430_vm8, %v1400_v42  ;;  %v3808_v39 = vpack.c.bf16 %v2493_v8, %v2491_v36  ;;  %v3794_v8 = vpack.c.bf16 %v4060_v31, %v4065_v54 }
 0x30b   : > { %3779 = vmatprep.subr.bf16.mxu1 %v5051_v58  ;;  %3575 = vmatmul.mubr.msk.f32.gmra.mrb[6].mxu0 %vm1430_vm8, %v5239_v23  ;;  %v2715_v49 = vsel %vm884_vm5, %v4114_v43, %v4109_v57  ;;  %v2717_v3 = vsel %vm884_vm5, %v4115_v6, %v4104_v38  ;;  %v3786_v57 = vpack.c.bf16 %v4030_v62, %v4040_v10  ;;  %v5377_v38 = vld [vmem:[%s5548_s6 + $0xb8] sm:$0xff] }
 0x30c   : > { %2353 = vmatprep.mubr.f32.mxu0 %v4189_v19  ;;  %v5293_v59 = vpop.permute.xlu0 %4117 }
 0x30d   : > { %3684 = vmatmul.mubr.msk.f32.gmra.mrb[10].mxu1 %vm1430_vm8, %v1401_v2  ;;  %v4120_v35 = vunpack.i.h.bf16 %v5293_v59  ;;  %v4119_v37 = vunpack.i.l.bf16 %v5293_v59  ;;  %v3816_v2 = vpack.c.bf16 %v2717_v3, %v2715_v49 }
 0x30e   : > { %1693 = vmatprep.mubr.f32.mxu1 %v4189_v19 }
 0x30f   : > { %3580 = vmatmul.mubr.msk.f32.vlgmr.msra.gmra.mrb[0].mxu0 %vm1430_vm8, %v5256_v41  ;;  %v2942_v33 = vsel %vm957_vm6, %v4119_v37, %v4120_v35 }
 0x310   : > { %3809 = vmatpush1.bf16.msra.mxu0 %v3808_v39  ;;  %2359 = vmatprep.mubr.f32.mxu0 %v4189_v19  ;;  %v5360_v10 = vpop.permute.xlu0 %4137 }
 0x311   : > { %3815 = vmatprep.subr.bf16.mxu0 %v3814_v50  ;;  %3556 = vmatmul.mubr.msk.f32.vlgmr.msra.gmra.mrb[0].mxu1 %vm1430_vm8, %v1394_v52  ;;  %v4139_v60 = vunpack.i.l.bf16 %v5360_v10  ;;  %v3148_v50 = vld [vmem:[%s5548_s6 + $0x108] sm:$0xff] }
 0x312   : > { %3781 = vmatpush3.bf16.msra.mxu1 %v5051_v58  ;;  %1699 = vmatprep.mubr.f32.mxu1 %v4189_v19  ;;  %v1396_v58 = vld [vmem:[%s5548_s6 + $0x10] sm:$0xff] }
 0x313   : > { %3838 = vmatprep.subr.bf16.mxu1 %v5105_v44  ;;  %3581 = vmatmul.mubr.msk.f32.gmra.mrb[2].mxu0 %vm1430_vm8, %v5276_v7  ;;  %v5300_v44 = vpop.permute.xlu1 %4122 }
 0x314   : > { %2365 = vmatprep.mubr.f32.mxu0 %v4189_v19  ;;  %v4125_v42 = vunpack.i.h.bf16 %v5300_v44  ;;  %v4124_v26 = vunpack.i.l.bf16 %v5300_v44 }
 0x315   : > { %3557 = vmatmul.mubr.msk.f32.gmra.mrb[2].mxu1 %vm1430_vm8, %v1395_v34 }
 0x316   : > { %1705 = vmatprep.mubr.f32.mxu1 %v4189_v19  ;;  %v2940_v21 = vsel %vm957_vm6, %v4124_v26, %v4125_v42  ;;  %v3826_v24 = vpack.c.bf16 %v4120_v35, %v4125_v42 }
 0x317   : > { %3582 = vmatmul.mubr.msk.f32.gmra.mrb[4].mxu0 %vm1430_vm8, %v5291_v55  ;;  %v3822_v4 = vpack.c.bf16 %v2942_v33, %v2940_v21  ;;  %v4128_v53 = vpop.permute.xlu1 %4127 }
 0x318   : > { %2371 = vmatprep.mubr.f32.mxu0 %v4189_v19  ;;  %v4130_v32 = vunpack.i.h.bf16 %v4128_v53  ;;  %v4129_v36 = vunpack.i.l.bf16 %v4128_v53 }
 0x319   : > { %3558 = vmatmul.mubr.msk.f32.gmra.mrb[4].mxu1 %vm1430_vm8, %v1396_v58 }
 0x31a   : > { %1711 = vmatprep.mubr.f32.mxu1 %v4189_v19  ;;  %v2939_v16 = vsel %vm957_vm6, %v4129_v36, %v4124_v26 }
 0x31b   : > { %3583 = vmatmul.mubr.msk.f32.gmra.mrb[6].mxu0 %vm1430_vm8, %v5310_v56  ;;  %v5367_v62 = vpop.permute.xlu1 %4132 }
 0x31c   : > { %2577 = vmatprep.mubr.f32.mxu0 %v4189_v19  ;;  %v4135_v39 = vunpack.i.h.bf16 %v5367_v62  ;;  %v4134_v22 = vunpack.i.l.bf16 %v5367_v62 }
 0x31d   : > { %3559 = vmatmul.mubr.msk.f32.gmra.mrb[6].mxu1 %vm1430_vm8, %v1397_v40 }
 0x31e   : > { %3690 = vmatprep.mubr.msk.f32.mxu1 %vm1430_vm8, %v1394_v52  ;;  %v2941_v52 = vsel %vm957_vm6, %v4130_v32, %v4119_v37  ;;  %v3166_v48 = vsel %vm1030_vm13, %v4134_v22, %v4135_v39 }
 0x31f   : > { %3588 = vmatmul.mubr.msk.f32.vlgmr.msra.gmra.mrb[0].mxu0 %vm1430_vm8, %v5327_v29  ;;  %v3824_v31 = vpack.c.bf16 %v2941_v52, %v2939_v16 }
 0x320   : > { %3817 = vmatpush1.bf16.msra.mxu0 %v3816_v2  ;;  %2583 = vmatprep.mubr.f32.mxu0 %v4189_v19 }
 0x321   : > { %3823 = vmatprep.subr.bf16.mxu0 %v3822_v4  ;;  %3691 = vmatmul.mubr.msk.f32.vlgmr.msra.gmra.mrb[8].mxu1 %vm1430_vm8, %v1395_v34  ;;  %v3150_v34 = vld [vmem:[%s5548_s6 + $0x118] sm:$0xff] }
 0x322   : > { %3839 = vmatpush1.bf16.msra.mxu1 %v5107_v63  ;;  %3693 = vmatprep.mubr.msk.f32.mxu1 %vm1430_vm8, %v1396_v58  ;;  %v4140_v63 = vunpack.i.h.bf16 %v5360_v10 }
 0x323   : > { %3787 = vmatprep.subr.bf16.mxu1 %v3786_v57  ;;  %3589 = vmatmul.mubr.msk.f32.gmra.mrb[2].mxu0 %vm1430_vm8, %v5343_v27 }
 0x324   : > { %2589 = vmatprep.mubr.f32.mxu0 %v4189_v19  ;;  %v3164_v54 = vsel %vm1030_vm13, %v4139_v60, %v4140_v63 }
 0x325   : > { %3694 = vmatmul.mubr.msk.f32.gmra.mrb[10].mxu1 %vm1430_vm8, %v1397_v40  ;;  %v3830_v30 = vpack.c.bf16 %v3166_v48, %v3164_v54  ;;  %v3378_v40 = vpop.permute.xlu1 %3377 }
 0x326   : > { %1923 = vmatprep.mubr.f32.mxu1 %v4189_v19 }
 0x327   : > { %3590 = vmatmul.mubr.msk.f32.gmra.mrb[4].mxu0 %vm1430_vm8, %v5358_v46 }
 0x328   : > { %2595 = vmatprep.mubr.f32.mxu0 %v4189_v19 }
 0x329   : > { %3567 = vmatmul.mubr.msk.f32.vlgmr.msra.gmra.mrb[6].mxu1 %vm1430_vm8, %v1806_v61  ;;  %v3388_v53 = vpop.permute.xlu1 %3387 }
 0x32a   : > { %3789 = vmatpush3.bf16.msra.mxu1 %v3786_v57  ;;  %3700 = vmatprep.mubr.msk.f32.mxu1 %vm1430_vm8, %v5116_v11  ;;  %v3802_v11 = vpack.c.bf16 %v4075_v17, %v4080_v13  ;;  %v4143_v17 = vpop.permute.xlu0 %4142 }
 0x32b   : > { %3795 = vmatprep.subr.bf16.mxu1 %v3794_v8  ;;  %3591 = vmatmul.mubr.msk.f32.gmra.mrb[6].mxu0 %vm1430_vm8, %v5377_v38  ;;  %v4145_v13 = vunpack.i.h.bf16 %v4143_v17 }
 0x32c   : > { %2801 = vmatprep.mubr.f32.mxu0 %v4189_v19 }
 0x32d   : > { %3701 = vmatmul.mubr.msk.f32.vlgmr.msra.gmra.mrb[8].mxu1 %vm1430_vm8, %v5128_v20  ;;  %v2700_v20 = vld [vmem:[%s5548_s6 + $0xc8] sm:$0xff]  ;;  %v3165_v0 = vsel %vm1030_vm13, %v4145_v13, %v4134_v22 }
 0x32e   : > { %3797 = vmatpush3.bf16.msra.mxu1 %v3794_v8  ;;  %3703 = vmatprep.mubr.msk.f32.mxu1 %vm1430_vm8, %v5152_v45  ;;  %v2701_v45 = vld [vmem:[%s5548_s6 + $0xd0] sm:$0xff]  ;;  %v3383_v2 = vpop.permute.xlu0 %3382 }
 0x32f   : > { %3803 = vmatprep.subr.bf16.mxu1 %v3802_v11  ;;  %3596 = vmatmul.mubr.msk.f32.vlgmr.msra.gmra.mrb[0].mxu0 %vm1430_vm8, %v5395_v25 }
 0x330   : > { %3825 = vmatpush1.bf16.msra.mxu0 %v3824_v31  ;;  %2807 = vmatprep.mubr.f32.mxu0 %v4189_v19 }
 0x331   : > { %3831 = vmatprep.subr.bf16.mxu0 %v3830_v30  ;;  %3704 = vmatmul.mubr.msk.f32.gmra.mrb[10].mxu1 %vm1430_vm8, %v1806_v61 }
 0x332   : > { %3710 = vmatprep.mubr.msk.f32.mxu1 %vm1430_vm8, %v5182_v1  ;;  %v4144_v1 = vunpack.i.l.bf16 %v4143_v17 }
 0x333   : > { %3597 = vmatmul.mubr.msk.f32.gmra.mrb[2].mxu0 %vm1430_vm8, %v2700_v20 }
 0x334   : > { %2813 = vmatprep.mubr.f32.mxu0 %v4189_v19  ;;  %v3163_v9 = vsel %vm1030_vm13, %v4144_v1, %v4139_v60 }
 0x335   : > { %3711 = vmatmul.mubr.msk.f32.vlgmr.msra.gmra.mrb[8].mxu1 %vm1430_vm8, %v5202_v47  ;;  %v2923_v47 = vld [vmem:[%s5548_s6 + $0xe0] sm:$0xff] }
 0x336   : > { %3805 = vmatpush3.bf16.msra.mxu1 %v3802_v11  ;;  %3713 = vmatprep.mubr.msk.f32.mxu1 %vm1430_vm8, %v5223_v18  ;;  %v3832_v18 = vpack.c.bf16 %v3165_v0, %v3163_v9 }
 0x337   : > { %3811 = vmatprep.subr.bf16.mxu1 %v3810_v51  ;;  %3598 = vmatmul.mubr.msk.f32.gmra.mrb[4].mxu0 %vm1430_vm8, %v2701_v45 }
 0x338   : > { %2819 = vmatprep.mubr.f32.mxu0 %v4189_v19 }
 0x339   : > { %3714 = vmatmul.mubr.msk.f32.gmra.mrb[10].mxu1 %vm1430_vm8, %v5239_v23  ;;  %v2926_v23 = vld [vmem:[%s5548_s6 + $0xf8] sm:$0xff] }
 0x33a   : > { %3720 = vmatprep.mubr.msk.f32.mxu1 %vm1430_vm8, %v5256_v41  ;;  %v3834_v41 = vpack.c.bf16 %v4135_v39, %v4140_v63  ;;  %v3393_v39 = vpop.permute.xlu0 %3392 }
 0x33b   : > { %3599 = vmatmul.mubr.msk.f32.gmra.mrb[6].mxu0 %vm1430_vm8, %v2702_v14 }
 0x33c   : > { %3025 = vmatprep.mubr.f32.mxu0 %v4189_v19 }
 0x33d   : > { %3721 = vmatmul.mubr.msk.f32.vlgmr.msra.gmra.mrb[8].mxu1 %vm1430_vm8, %v5276_v7  ;;  %v3149_v7 = vld [vmem:[%s5548_s6 + $0x110] sm:$0xff] }
 0x33e   : > { %3813 = vmatpush3.bf16.msra.mxu1 %v3810_v51  ;;  %3723 = vmatprep.mubr.msk.f32.mxu1 %vm1430_vm8, %v5291_v55 }
 0x33f   : > { %3819 = vmatprep.subr.bf16.mxu1 %v3818_v28  ;;  %3604 = vmatmul.mubr.msk.f32.vlgmr.msra.gmra.mrb[0].mxu0 %vm1430_vm8, %v2923_v47 }
 0x340   : > { %3833 = vmatpush1.bf16.msra.mxu0 %v3832_v18  ;;  %3031 = vmatprep.mubr.f32.mxu0 %v4189_v19 }
 0x341   : > { %3724 = vmatmul.mubr.msk.f32.gmra.mrb[10].mxu1 %vm1430_vm8, %v5310_v56 }
 0x342   : > { %3730 = vmatprep.mubr.msk.f32.mxu1 %vm1430_vm8, %v5327_v29 }
 0x343   : > { %3605 = vmatmul.mubr.msk.f32.gmra.mrb[2].mxu0 %vm1430_vm8, %v2924_v12 }
 0x344   : > { %3037 = vmatprep.mubr.f32.mxu0 %v4189_v19 }
 0x345   : > { %3731 = vmatmul.mubr.msk.f32.vlgmr.msra.gmra.mrb[8].mxu1 %vm1430_vm8, %v5343_v27 }
 0x346   : > { %3821 = vmatpush3.bf16.msra.mxu1 %v3818_v28  ;;  %3733 = vmatprep.mubr.msk.f32.mxu1 %vm1430_vm8, %v5358_v46 }
 0x347   : > { %3606 = vmatmul.mubr.msk.f32.gmra.mrb[4].mxu0 %vm1430_vm8, %v2925_v5  ;;  %3827 = vmatprep.subr.bf16.mxu1 %v3826_v24 }
 0x348   : > { %3043 = vmatprep.mubr.f32.mxu0 %v4189_v19 }
 0x349   : > { %3734 = vmatmul.mubr.msk.f32.gmra.mrb[10].mxu1 %vm1430_vm8, %v5377_v38 }
 0x34a   : > { %3740 = vmatprep.mubr.msk.f32.mxu1 %vm1430_vm8, %v5395_v25 }
 0x34b   : > { %3607 = vmatmul.mubr.msk.f32.gmra.mrb[6].mxu0 %vm1430_vm8, %v2926_v23 }
 0x34c   : > { %3249 = vmatprep.mubr.f32.mxu0 %v4189_v19 }
 0x34d   : > { %3741 = vmatmul.mubr.msk.f32.vlgmr.msra.gmra.mrb[8].mxu1 %vm1430_vm8, %v2700_v20 }
 0x34e   : > { %3829 = vmatpush3.bf16.msra.mxu1 %v3826_v24  ;;  %3743 = vmatprep.mubr.msk.f32.mxu1 %vm1430_vm8, %v2701_v45 }
 0x34f   : > { %3612 = vmatmul.mubr.msk.f32.vlgmr.msra.gmra.mrb[0].mxu0 %vm1430_vm8, %v3147_v15  ;;  %3835 = vmatprep.subr.bf16.mxu1 %v3834_v41 }
 0x350   : > { %3255 = vmatprep.mubr.f32.mxu0 %v4189_v19 }
 0x351   : > { %3744 = vmatmul.mubr.msk.f32.gmra.mrb[10].mxu1 %vm1430_vm8, %v2702_v14 }
 0x352   : > { %3750 = vmatprep.mubr.msk.f32.mxu1 %vm1430_vm8, %v2923_v47 }
 0x353   : > { %3613 = vmatmul.mubr.msk.f32.gmra.mrb[2].mxu0 %vm1430_vm8, %v3148_v50 }
 0x354   : > { %3261 = vmatprep.mubr.f32.mxu0 %v4189_v19 }
 0x355   : > { %3751 = vmatmul.mubr.msk.f32.vlgmr.msra.gmra.mrb[8].mxu1 %vm1430_vm8, %v2924_v12 }
 0x356   : > { %3837 = vmatpush3.bf16.msra.mxu1 %v3834_v41  ;;  %3753 = vmatprep.mubr.msk.f32.mxu1 %vm1430_vm8, %v2925_v5 }
 0x357   : > { %3614 = vmatmul.mubr.msk.f32.gmra.mrb[4].mxu0 %vm1430_vm8, %v3149_v7 }
 0x358   : > { %3267 = vmatprep.mubr.f32.mxu0 %v4189_v19 }
 0x359   : > { %3754 = vmatmul.mubr.msk.f32.gmra.mrb[10].mxu1 %vm1430_vm8, %v2926_v23 }
 0x35a   : > { %3760 = vmatprep.mubr.msk.f32.mxu1 %vm1430_vm8, %v3147_v15 }
 0x35b   : > { %3615 = vmatmul.mubr.msk.f32.gmra.mrb[6].mxu0 %vm1430_vm8, %v3150_v34 }
 0x35d   : > { %3761 = vmatmul.mubr.msk.f32.vlgmr.msra.gmra.mrb[8].mxu1 %vm1430_vm8, %v3148_v50 }
 0x35e   : > { %3763 = vmatprep.mubr.msk.f32.mxu1 %vm1430_vm8, %v3149_v7 }
 0x361   : > { %3764 = vmatmul.mubr.msk.f32.gmra.mrb[10].mxu1 %vm1430_vm8, %v3150_v34 }
 0x3e4   : > { %v1695_v55 = vpop.f32.mrb[0].mxu1 }
 0x3e5   : > { %v1697_v59 = vpop.f32.mrb[1].mxu1 }
 0x3e8   : > { %v1701_v58 = vpop.f32.mrb[2].mxu1 }
 0x3e9   : > { %v1703_v19 = vpop.f32.mrb[3].mxu1 }
 0x3ec   : > { %v1707_v44 = vpop.f32.mrb[4].mxu1 }
 0x3ed   : > { %v1709_v6 = vpop.f32.mrb[5].mxu1 }
 0x3fc   : > { %v1925_v43 = vpop.f32.mrb[6].mxu1 }
 0x3fd   : > { %v1927_v35 = vpop.f32.mrb[7].mxu1 }
 0x422   : > { %v3251_v37 = vpop.f32.mrb[0].mxu0 }
 0x423   : > { %v3840_v56 = vadd.f32 %v3251_v37, %v1695_v55  ;;  %v3253_v42 = vpop.f32.mrb[1].mxu0 }
 0x424   : > { %v3841_v26 = vadd.f32 %v3253_v42, %v1697_v59 }
 0x425   : > { %v3395_v4 = vadd.f32 %v3840_v56, %v3378_v40 }
 0x426   : > { %v3257_v49 = vpop.f32.mrb[2].mxu0  ;;  %v3396_v46 = vadd.f32 %v3841_v26, %v3378_v40 }
 0x427   : > { %v3842_v3 = vadd.f32 %v3257_v49, %v1701_v58  ;;  %v3259_v29 = vpop.f32.mrb[3].mxu0  ;;  %v3407_v60 = vmax.f32 %v3395_v4, 0.0 }
 0x428   : > { %v3843_v33 = vadd.f32 %v3259_v29, %v1703_v19  ;;  %v3408_v22 = vmax.f32 %v3396_v46, 0.0 }
 0x429   : > { %v3398_v38 = vadd.f32 %v3842_v3, %v3383_v2 }
 0x42a   : > { %v3263_v21 = vpop.f32.mrb[4].mxu0  ;;  %v3399_v52 = vadd.f32 %v3843_v33, %v3383_v2 }
 0x42b   : > { %v3844_v27 = vadd.f32 %v3263_v21, %v1707_v44  ;;  %v3265_v57 = vpop.f32.mrb[5].mxu0  ;;  %v3410_v17 = vmax.f32 %v3398_v38, 0.0 }
 0x42c   : > { %v3845_v10 = vadd.f32 %v3265_v57, %v1709_v6  ;;  %v3411_v13 = vmax.f32 %v3399_v52, 0.0 }
 0x42d   : > { %v3401_v61 = vadd.f32 %v3844_v27, %v3388_v53 }
 0x42e   : > { %v3402_v62 = vadd.f32 %v3845_v10, %v3388_v53  ;;  %v3269_v63 = vpop.f32.mrb[6].mxu0 }
 0x42f   : > { %v3413_v8 = vmax.f32 %v3401_v61, 0.0  ;;  %v3846_v32 = vadd.f32 %v3269_v63, %v1925_v43  ;;  %v3271_v36 = vpop.f32.mrb[7].mxu0 }
 0x430   : > { %v3414_v25 = vmax.f32 %v3402_v62, 0.0  ;;  %v3847_v54 = vadd.f32 %v3271_v36, %v1927_v35  ;;  %v3762_v11 = vpop.f32.mrb[8].mxu1 }
 0x431   : > { %v3426_v16 = vadd.f32 %v3413_v8, %v3407_v60  ;;  %v3404_v31 = vadd.f32 %v3846_v32, %v3393_v39  ;;  %v3340_v48 = vpop.f32.mrb[9].mxu1  ;;  %v3400_v51 = vadd.f32 %v3762_v11, %v3383_v2 }
 0x432   : > { %v3427_v30 = vadd.f32 %v3414_v25, %v3408_v22  ;;  %v3405_v20 = vadd.f32 %v3847_v54, %v3393_v39  ;;  %v3397_v14 = vadd.f32 %v3378_v40, %v3340_v48 }
 0x433   : > { %3432 = vst [vmem:[%s5529_s28] sm:$0xff] %v3426_v16  ;;  %v3416_v45 = vmax.f32 %v3404_v31, 0.0  ;;  %v3412_v5 = vmax.f32 %v3400_v51, 0.0 }
 0x434   : > { %3433 = vst [vmem:[%s5529_s28 + $0x8] sm:$0xff] %v3427_v30  ;;  %v3417_v1 = vmax.f32 %v3405_v20, 0.0  ;;  %v3765_v9 = vpop.f32.mrb[10].mxu1  ;;  %v3409_v23 = vmax.f32 %v3397_v14, 0.0 }
 0x435   : > { %v3429_v0 = vadd.f32 %v3416_v45, %v3410_v17  ;;  %v3406_v47 = vadd.f32 %v3765_v9, %v3393_v39  ;;  %v3350_v28 = vpop.f32.mrb[11].mxu1 }
 0x436   : > { %v3430_v18 = vadd.f32 %v3417_v1, %v3411_v13  ;;  %v3403_v12 = vadd.f32 %v3388_v53, %v3350_v28 }
 0x437   : > { %3435 = vst [vmem:[%s5529_s28 + $0x18] sm:$0xff] %v3429_v0  ;;  %v3418_v24 = vmax.f32 %v3406_v47, 0.0 }
 0x438   : > { %3436 = vst [vmem:[%s5529_s28 + $0x20] sm:$0xff] %v3430_v18  ;;  %v3415_v15 = vmax.f32 %v3403_v12, 0.0 }
 0x439   : > { %v3431_v41 = vadd.f32 %v3418_v24, %v3412_v5 }
 0x43a   : > { %v3428_v50 = vadd.f32 %v3415_v15, %v3409_v23 }
 0x43b   : > { %3437 = vst.msk [vmem:[%s5529_s28 + $0x28] sm:$0xff] %vm3424_vm14, %v3431_v41 }
 0x43c   : > { %3434 = vst.msk [vmem:[%s5529_s28 + $0x10] sm:$0xff] %vm3424_vm14, %v3428_v50 }
 0x43d PF: > { %s20_s30 = sadd.s32 1, %s4152_s30  }
 0x43e   : > { %p17_p4 = scmp.ge.s32.totalorder %s20_s30, 4  }
 0x440   :  { %19 = sbr.rel (!%p17_p4) target bundleno = 1 (0x1), region = 99 }

</bundles_post_ra>
